<compile_context>
chip_gen: v7x
topology: tpu7x:2x2x1
jax: 0.10.0
libtpu: 0.0.40
codegen_flags: <defaults>
</compile_context>

<pallas_src>
import functools
import math

import jax
import jax.numpy as jnp
from jax.experimental import pallas as pl
from jax.experimental.pallas import tpu as pltpu


def _vmem_limit_bytes():
    """Generation-aware scoped-VMEM budget (v5e/v6e: ~96 MiB, v7x: 48 MiB)."""
    try:
        cap = pltpu.get_tpu_info().vmem_capacity_bytes
    except Exception:
        cap = 64 * 1024 * 1024
    return min(int(cap) * 3 // 4, 100 * 1024 * 1024)


VMEM_LIMIT = _vmem_limit_bytes()


def _tile(dim, target):
    """Largest 128-granular tile <= target that divides dim (or the full dim)."""
    if dim <= target:
        return dim
    t = (target // 128) * 128
    while t >= 128:
        if dim % t == 0:
            return t
        t -= 128
    return dim


# -----------------------------------------------------------------------------
# Kernel A: tiled matmul + bias (QKV projection).  bf16 output (HBM boundary).
# -----------------------------------------------------------------------------
def _matmul_bias_kernel(x_ref, w_ref, b_ref, o_ref, acc_ref):
    k = pl.program_id(2)

    @pl.when(k == 0)
    def _():
        acc_ref[...] = jnp.zeros_like(acc_ref)

    acc_ref[...] += jnp.dot(
        x_ref[...].astype(jnp.bfloat16),
        w_ref[...].astype(jnp.bfloat16),
        preferred_element_type=jnp.float32,
    )

    @pl.when(k == pl.num_programs(2) - 1)
    def _():
        o_ref[...] = (acc_ref[...] + b_ref[...].astype(jnp.float32)).astype(o_ref.dtype)


def matmul_bias(x, w, b, *, tm=512, tn=512, tk=512):
    """x: (M, K) bf16/f32, w: (K, N) bf16, b: (N,) f32 -> (M, N) bf16."""
    M, K = x.shape
    N = w.shape[1]
    tm, tn, tk = _tile(M, tm), _tile(N, tn), _tile(K, tk)
    return pl.pallas_call(
        _matmul_bias_kernel,
        out_shape=jax.ShapeDtypeStruct((M, N), jnp.bfloat16),
        grid=(M // tm, N // tn, K // tk),
        in_specs=[
            pl.BlockSpec((tm, tk), lambda i, j, k: (i, k)),
            pl.BlockSpec((tk, tn), lambda i, j, k: (k, j)),
            pl.BlockSpec((1, tn), lambda i, j, k: (0, j)),
        ],
        out_specs=pl.BlockSpec((tm, tn), lambda i, j, k: (i, j)),
        scratch_shapes=[pltpu.VMEM((tm, tn), jnp.float32)],
        compiler_params=pltpu.CompilerParams(
            dimension_semantics=("parallel", "parallel", "arbitrary"),
            vmem_limit_bytes=VMEM_LIMIT,
        ),
    )(x, w, b.reshape(1, N))


# -----------------------------------------------------------------------------
# Kernel B: attention core.  One batch per grid step, heads statically
# unrolled.  Each head slices the qkv ref directly and stores its context
# straight into the output ref slice (no full-tile load, no concat).
# Attention scale is pre-folded into w_in / b_in on the host.
# -----------------------------------------------------------------------------
def _attn_kernel(qkv_ref, o_ref, *, nhead, d_model):
    dh = d_model // nhead
    for h in range(nhead):  # static unroll; one head live at a time
        q = qkv_ref[0, :, h * dh:(h + 1) * dh]                               # (S, dh) bf16
        k = qkv_ref[0, :, d_model + h * dh:d_model + (h + 1) * dh]           # (S, dh) bf16
        v = qkv_ref[0, :, 2 * d_model + h * dh:2 * d_model + (h + 1) * dh]   # (S, dh) bf16
        # scores: contract on dh axis, no explicit k.T materialization.
        s = jax.lax.dot_general(
            q, k, (((1,), (1,)), ((), ())),
            preferred_element_type=jnp.float32,
        )  # (S, S) f32
        s = s - jnp.max(s, axis=-1, keepdims=True)
        p = jnp.exp(s)
        p = p * pl.reciprocal(jnp.sum(p, axis=-1, keepdims=True), approx=True)
        ctx = jax.lax.dot_general(
            p.astype(v.dtype), v, (((1,), (0,)), ((), ())),
            preferred_element_type=jnp.float32,
        )  # (S, dh) f32
        o_ref[0, :, h * dh:(h + 1) * dh] = ctx.astype(o_ref.dtype)


def attention(qkv, nhead, d_model):
    """qkv: (B, S, 3D) bf16 -> ctx: (B, S, D) bf16."""
    B, S, threeD = qkv.shape
    kern = functools.partial(_attn_kernel, nhead=nhead, d_model=d_model)
    return pl.pallas_call(
        kern,
        out_shape=jax.ShapeDtypeStruct((B, S, d_model), jnp.bfloat16),
        grid=(B,),
        in_specs=[pl.BlockSpec((1, S, threeD), lambda b: (b, 0, 0))],
        out_specs=pl.BlockSpec((1, S, d_model), lambda b: (b, 0, 0)),
        compiler_params=pltpu.CompilerParams(
            dimension_semantics=("parallel",),
            vmem_limit_bytes=VMEM_LIMIT,
        ),
    )(qkv)


# -----------------------------------------------------------------------------
# Kernel C: out-projection matmul + bias + residual-add + LayerNorm epilogue.
# bf16 output (HBM boundary); LN math in f32.
# -----------------------------------------------------------------------------
def _proj_add_ln_kernel(x_ref, w_ref, b_ref, res_ref, g_ref, bln_ref,
                        o_ref, acc_ref, *, eps):
    k = pl.program_id(1)

    @pl.when(k == 0)
    def _():
        acc_ref[...] = jnp.zeros_like(acc_ref)

    acc_ref[...] += jnp.dot(
        x_ref[...].astype(jnp.bfloat16),
        w_ref[...].astype(jnp.bfloat16),
        preferred_element_type=jnp.float32,
    )

    @pl.when(k == pl.num_programs(1) - 1)
    def _():
        y = (acc_ref[...] + b_ref[...].astype(jnp.float32)
             + res_ref[...].astype(jnp.float32))
        mean = jnp.mean(y, axis=-1, keepdims=True)
        cent = y - mean
        var = jnp.mean(cent * cent, axis=-1, keepdims=True)
        yn = cent * jax.lax.rsqrt(var + eps)
        o_ref[...] = (yn * g_ref[...].astype(jnp.float32)
                      + bln_ref[...].astype(jnp.float32)).astype(o_ref.dtype)


def proj_add_layernorm(x, w, b, residual, gamma, beta, *, eps=1e-5, tm=256, tk=512):
    """LayerNorm(residual + x @ w + b) -> bf16.  x: (M, K), w: (K, D)."""
    M, K = x.shape
    D = w.shape[1]
    if D >= 4096:  # keep the (tm, D) accumulator + residual small on v7x
        tm, tk = min(tm, 128), min(tk, 256)
    tm, tk = _tile(M, tm), _tile(K, tk)
    kern = functools.partial(_proj_add_ln_kernel, eps=eps)
    return pl.pallas_call(
        kern,
        out_shape=jax.ShapeDtypeStruct((M, D), jnp.bfloat16),
        grid=(M // tm, K // tk),
        in_specs=[
            pl.BlockSpec((tm, tk), lambda i, k: (i, k)),
            pl.BlockSpec((tk, D), lambda i, k: (k, 0)),
            pl.BlockSpec((1, D), lambda i, k: (0, 0)),
            pl.BlockSpec((tm, D), lambda i, k: (i, 0)),
            pl.BlockSpec((1, D), lambda i, k: (0, 0)),
            pl.BlockSpec((1, D), lambda i, k: (0, 0)),
        ],
        out_specs=pl.BlockSpec((tm, D), lambda i, k: (i, 0)),
        scratch_shapes=[pltpu.VMEM((tm, D), jnp.float32)],
        compiler_params=pltpu.CompilerParams(
            dimension_semantics=("parallel", "arbitrary"),
            vmem_limit_bytes=VMEM_LIMIT,
        ),
    )(x, w, b.reshape(1, D), residual, gamma.reshape(1, D), beta.reshape(1, D))


# -----------------------------------------------------------------------------
# Kernel D: fused FFN (relu(x@W1+b1)@W2+b2) + residual-add + LayerNorm.
# Grid-tiled over dim_ff; the ReLU intermediate is additionally sub-tiled
# (<=256 cols) inside the body so each chunk stays vreg-resident.
# -----------------------------------------------------------------------------
def _ffn_add_ln_kernel(x_ref, w1_ref, b1_ref, w2_ref, b2_ref, g_ref, bln_ref,
                       o_ref, acc_ref, *, eps, tf_inner):
    f = pl.program_id(1)

    @pl.when(f == 0)
    def _():
        acc_ref[...] = jnp.zeros_like(acc_ref)

    xb = x_ref[...].astype(jnp.bfloat16)
    tf = w1_ref.shape[1]
    for c in range(tf // tf_inner):  # static sub-tiling of the ReLU intermediate
        lo = c * tf_inner
        hi = lo + tf_inner
        h = jnp.dot(xb, w1_ref[:, lo:hi].astype(jnp.bfloat16),
                    preferred_element_type=jnp.float32)
        h = jnp.maximum(h + b1_ref[:, lo:hi].astype(jnp.float32), 0.0)
        acc_ref[...] += jnp.dot(h.astype(jnp.bfloat16),
                                w2_ref[lo:hi, :].astype(jnp.bfloat16),
                                preferred_element_type=jnp.float32)

    @pl.when(f == pl.num_programs(1) - 1)
    def _():
        y = (acc_ref[...] + b2_ref[...].astype(jnp.float32)
             + x_ref[...].astype(jnp.float32))
        mean = jnp.mean(y, axis=-1, keepdims=True)
        cent = y - mean
        var = jnp.mean(cent * cent, axis=-1, keepdims=True)
        yn = cent * jax.lax.rsqrt(var + eps)
        o_ref[...] = (yn * g_ref[...].astype(jnp.float32)
                      + bln_ref[...].astype(jnp.float32)).astype(o_ref.dtype)


def ffn_add_layernorm(x, w1, b1, w2, b2, gamma, beta, *, eps=1e-5, tm=256, tf=512,
                      out_dtype=jnp.bfloat16):
    """LayerNorm(x + relu(x@w1+b1)@w2+b2).  x: (M, D), w1: (D, F), w2: (F, D)."""
    M, D = x.shape
    F = w1.shape[1]
    if D >= 4096:  # keep (tm, D) accumulator/residual + full-D weight tiles small
        tm, tf = min(tm, 128), min(tf, 256)
    tm, tf = _tile(M, tm), _tile(F, tf)
    tf_inner = _tile(tf, 256)
    kern = functools.partial(_ffn_add_ln_kernel, eps=eps, tf_inner=tf_inner)
    return pl.pallas_call(
        kern,
        out_shape=jax.ShapeDtypeStruct((M, D), out_dtype),
        grid=(M // tm, F // tf),
        in_specs=[
            pl.BlockSpec((tm, D), lambda i, f: (i, 0)),   # x (matmul lhs + residual)
            pl.BlockSpec((D, tf), lambda i, f: (0, f)),   # w1 column tile
            pl.BlockSpec((1, tf), lambda i, f: (0, f)),   # b1
            pl.BlockSpec((tf, D), lambda i, f: (f, 0)),   # w2 row tile
            pl.BlockSpec((1, D), lambda i, f: (0, 0)),    # b2
            pl.BlockSpec((1, D), lambda i, f: (0, 0)),    # ln gamma
            pl.BlockSpec((1, D), lambda i, f: (0, 0)),    # ln beta
        ],
        out_specs=pl.BlockSpec((tm, D), lambda i, f: (i, 0)),
        scratch_shapes=[pltpu.VMEM((tm, D), jnp.float32)],
        compiler_params=pltpu.CompilerParams(
            dimension_semantics=("parallel", "arbitrary"),
            vmem_limit_bytes=VMEM_LIMIT,
        ),
    )(x, w1, b1.reshape(1, F), w2, b2.reshape(1, D),
      gamma.reshape(1, D), beta.reshape(1, D))


# -----------------------------------------------------------------------------
# Encoder layer + stacked module
# -----------------------------------------------------------------------------
def encoder_layer_fwd(x, params, nhead, *, out_dtype=jnp.bfloat16):
    """One post-norm transformer encoder layer. x: (B, S, D)."""
    B, S, D = x.shape
    M = B * S
    x2 = x.reshape(M, D)
    # Cast activations to bf16 once at layer entry (no-op for layers > 0).
    x_mm = x2 if x2.dtype == jnp.bfloat16 else x2.astype(jnp.bfloat16)

    # --- self-attention block (QKV proj -> attention -> out-proj + add + LN) ---
    qkv = matmul_bias(x_mm, params["w_in"], params["b_in"])            # (M, 3D) bf16
    ctx = attention(qkv.reshape(B, S, 3 * D), nhead, D)                # (B, S, D) bf16
    x1 = proj_add_layernorm(ctx.reshape(M, D), params["w_out"], params["b_out"],
                            x2, params["ln1_g"], params["ln1_b"])      # (M, D) bf16

    # --- fused feed-forward block (+ add + LN) ---
    x3 = ffn_add_layernorm(x1, params["w_ff1"], params["b_ff1"],
                           params["w_ff2"], params["b_ff2"],
                           params["ln2_g"], params["ln2_b"],
                           out_dtype=out_dtype)

    return x3.reshape(B, S, D)


def custom_transformer_encoder_moe(src, params, nhead, num_layers):
    """Applies the SAME encoder layer (shared params) num_layers times,
    matching `nn.ModuleList([encoder_layer for _ in range(num_layers)])`."""
    D = src.shape[-1]
    dh = D // nhead
    scale = 1.0 / math.sqrt(dh)
    # Fold the attention scale into the q columns of w_in / b_in (done once,
    # shared weights), then cast weight matrices to bf16; biases / LN stay f32.
    p = dict(params)
    p["w_in"] = params["w_in"].at[:, :D].multiply(scale)
    p["b_in"] = params["b_in"].at[:D].multiply(scale)
    for name in ("w_in", "w_out", "w_ff1", "w_ff2"):
        p[name] = p[name].astype(jnp.bfloat16)
    out = src
    for i in range(num_layers):
        last = i == num_layers - 1
        out = encoder_layer_fwd(
            out, p, nhead,
            out_dtype=jnp.float32 if last else jnp.bfloat16)
    return out


# -----------------------------------------------------------------------------
# Pure-JAX f32 reference (same math, same shared weights) for validation
# -----------------------------------------------------------------------------
def _ln_ref(x, g, b, eps=1e-5):
    m = x.mean(-1, keepdims=True)
    v = ((x - m) ** 2).mean(-1, keepdims=True)
    return (x - m) * jax.lax.rsqrt(v + eps) * g + b


def reference_forward(src, params, nhead, num_layers):
    def layer(x):
        B, S, D = x.shape
        dh = D // nhead
        x2 = x.reshape(B * S, D)
        qkv = x2 @ params["w_in"] + params["b_in"]
        q, k, v = jnp.split(qkv, 3, axis=-1)

        def heads(t):
            return t.reshape(B, S, nhead, dh).transpose(0, 2, 1, 3)

        qh, kh, vh = heads(q), heads(k), heads(v)
        s = jnp.einsum("bhqd,bhkd->bhqk", qh, kh) / math.sqrt(dh)
        p = jax.nn.softmax(s, axis=-1)
        ctx = jnp.einsum("bhqk,bhkd->bhqd", p, vh)
        ctx = ctx.transpose(0, 2, 1, 3).reshape(B * S, D)
        a = ctx @ params["w_out"] + params["b_out"]
        x1 = _ln_ref(x2 + a, params["ln1_g"], params["ln1_b"])
        h = jnp.maximum(x1 @ params["w_ff1"] + params["b_ff1"], 0.0)
        y = h @ params["w_ff2"] + params["b_ff2"]
        x3 = _ln_ref(x1 + y, params["ln2_g"], params["ln2_b"])
        return x3.reshape(B, S, D)

    out = src
    for _ in range(num_layers):
        out = layer(out)
    return out


# -----------------------------------------------------------------------------
# Deterministic parameter init (shapes follow nn.TransformerEncoderLayer)
# -----------------------------------------------------------------------------
def init_params(key, d_model, dim_ff):
    ks = jax.random.split(key, 6)
    s = 0.02
    return {
        "w_in": s * jax.random.normal(ks[0], (d_model, 3 * d_model), jnp.float32),
        "b_in": jnp.zeros((3 * d_model,), jnp.float32),
        "w_out": s * jax.random.normal(ks[1], (d_model, d_model), jnp.float32),
        "b_out": jnp.zeros((d_model,), jnp.float32),
        "w_ff1": s * jax.random.normal(ks[2], (d_model, dim_ff), jnp.float32),
        "b_ff1": jnp.zeros((dim_ff,), jnp.float32),
        "w_ff2": s * jax.random.normal(ks[3], (dim_ff, d_model), jnp.float32),
        "b_ff2": jnp.zeros((d_model,), jnp.float32),
        "ln1_g": jnp.ones((d_model,), jnp.float32),
        "ln1_b": jnp.zeros((d_model,), jnp.float32),
        "ln2_g": jnp.ones((d_model,), jnp.float32),
        "ln2_b": jnp.zeros((d_model,), jnp.float32),
    }


def _run_case(B, S, D, nhead, dff, num_layers, seed, tol):
    key = jax.random.PRNGKey(seed)
    k_x, k_p = jax.random.split(key)
    x = jax.random.normal(k_x, (B, S, D), jnp.float32)   # (batch, seq, d_model)
    params = init_params(k_p, D, dff)

    fwd = jax.jit(functools.partial(
        custom_transformer_encoder_moe, nhead=nhead, num_layers=num_layers))
    out = fwd(x, params)
    jax.block_until_ready(out)

    assert out.shape == (B, S, D) and out.dtype == jnp.float32
    assert bool(jnp.all(jnp.isfinite(out)))

    ref = reference_forward(x, params, nhead, num_layers)
    max_err = float(jnp.max(jnp.abs(out - ref)))
    assert max_err < tol, f"max abs error vs reference: {max_err} (tol={tol})"
    return max_err


if __name__ == "__main__":
    # Small shape matching the module's typical toy config.
    _run_case(B=2, S=8, D=32, nhead=4, dff=64, num_layers=2, seed=0, tol=0.1)
    # Larger head-dim / model-dim case to catch layout / head-ordering bugs
    # (dh = 64 >= lane-sublane-relevant sizes), per the review.
    _run_case(B=1, S=64, D=256, nhead=4, dff=512, num_layers=1, seed=1, tol=0.2)
    print("KERNEL_OK")
</pallas_src>

<mosaic_0001>
module attributes {stable_mosaic.version = 11 : i64} {
  func.func @_attn_kernel(%arg0: i32, %arg1: memref<1x8x96xbf16, #tpu.memory_space<vmem>>, %arg2: memref<1x8x32xbf16, #tpu.memory_space<vmem>>) attributes {dimension_semantics = [#tpu.dimension_semantics<parallel>], iteration_bounds = array<i64: 2>, scalar_prefetch = 0 : i64, scratch_operands = 0 : i64, tpu.core_type = #tpu.core_type<tc>, window_params = [{transform_indices = @transform_0, window_bounds = array<i64: 1, 8, 96>}, {transform_indices = @transform_1, window_bounds = array<i64: 1, 8, 32>}]} {
    %c0 = arith.constant 0 : index
    %c0_0 = arith.constant 0 : index
    %c0_1 = arith.constant 0 : index
    %0 = vector.load %arg1[%c0, %c0_0, %c0_1] : memref<1x8x96xbf16, #tpu.memory_space<vmem>>, vector<1x8x8xbf16>
    %1 = vector.shape_cast %0 : vector<1x8x8xbf16> to vector<8x8xbf16>
    %c0_2 = arith.constant 0 : index
    %c0_3 = arith.constant 0 : index
    %c32 = arith.constant 32 : index
    %2 = vector.load %arg1[%c0_2, %c0_3, %c32] : memref<1x8x96xbf16, #tpu.memory_space<vmem>>, vector<1x8x8xbf16>
    %3 = vector.shape_cast %2 : vector<1x8x8xbf16> to vector<8x8xbf16>
    %c0_4 = arith.constant 0 : index
    %c0_5 = arith.constant 0 : index
    %c64 = arith.constant 64 : index
    %4 = vector.load %arg1[%c0_4, %c0_5, %c64] : memref<1x8x96xbf16, #tpu.memory_space<vmem>>, vector<1x8x8xbf16>
    %5 = vector.shape_cast %4 : vector<1x8x8xbf16> to vector<8x8xbf16>
    %cst = arith.constant dense<0.000000e+00> : vector<8x8xf32>
    %6 = tpu.matmul %1, %3, %cst {dimension_numbers = #tpu.dot_dimension_numbers<[1], [1], [0], [0], [0, 0, 1, 0], [], []>} : vector<8x8xbf16>, vector<8x8xbf16>, vector<8x8xf32> -> vector<8x8xf32>
    %cst_6 = arith.constant dense<0xFF800000> : vector<8xf32>
    %7 = vector.multi_reduction <maximumf>, %6, %cst_6 [1] : vector<8x8xf32> to vector<8xf32>
    %8 = vector.shape_cast %7 : vector<8xf32> to vector<8x1xf32>
    %9 = vector.broadcast %8 : vector<8x1xf32> to vector<8x8xf32>
    %10 = arith.subf %6, %9 : vector<8x8xf32>
    %11 = math.exp %10 : vector<8x8xf32>
    %cst_7 = arith.constant dense<0.000000e+00> : vector<8xf32>
    %12 = vector.multi_reduction <add>, %11, %cst_7 [1] : vector<8x8xf32> to vector<8xf32>
    %13 = vector.shape_cast %12 : vector<8xf32> to vector<8x1xf32>
    %14 = tpu.reciprocal %13 {approx = true} : vector<8x1xf32> -> vector<8x1xf32>
    %15 = vector.broadcast %14 : vector<8x1xf32> to vector<8x8xf32>
    %16 = arith.mulf %11, %15 : vector<8x8xf32>
    %17 = arith.truncf %16 : vector<8x8xf32> to vector<8x8xbf16>
    %cst_8 = arith.constant dense<0.000000e+00> : vector<8x8xf32>
    %18 = tpu.matmul %17, %5, %cst_8 {dimension_numbers = #tpu.dot_dimension_numbers<[1], [0], [0], [1], [0, 0, 1, 1], [], []>} : vector<8x8xbf16>, vector<8x8xbf16>, vector<8x8xf32> -> vector<8x8xf32>
    %19 = arith.truncf %18 : vector<8x8xf32> to vector<8x8xbf16>
    %c0_9 = arith.constant 0 : index
    %c0_10 = arith.constant 0 : index
    %c0_11 = arith.constant 0 : index
    %20 = vector.load %arg2[%c0_9, %c0_10, %c0_11] : memref<1x8x32xbf16, #tpu.memory_space<vmem>>, vector<1x8x8xbf16>
    %21 = vector.shape_cast %20 : vector<1x8x8xbf16> to vector<8x8xbf16>
    %22 = vector.shape_cast %19 : vector<8x8xbf16> to vector<1x8x8xbf16>
    tpu.vector_store %arg2[%c0_9, %c0_10, %c0_11], %22 {strides = array<i32>} : memref<1x8x32xbf16, #tpu.memory_space<vmem>>, vector<1x8x8xbf16>,
    %c0_12 = arith.constant 0 : index
    %c0_13 = arith.constant 0 : index
    %c8 = arith.constant 8 : index
    %23 = vector.load %arg1[%c0_12, %c0_13, %c8] : memref<1x8x96xbf16, #tpu.memory_space<vmem>>, vector<1x8x8xbf16>
    %24 = vector.shape_cast %23 : vector<1x8x8xbf16> to vector<8x8xbf16>
    %c0_14 = arith.constant 0 : index
    %c0_15 = arith.constant 0 : index
    %c40 = arith.constant 40 : index
    %25 = vector.load %arg1[%c0_14, %c0_15, %c40] : memref<1x8x96xbf16, #tpu.memory_space<vmem>>, vector<1x8x8xbf16>
    %26 = vector.shape_cast %25 : vector<1x8x8xbf16> to vector<8x8xbf16>
    %c0_16 = arith.constant 0 : index
    %c0_17 = arith.constant 0 : index
    %c72 = arith.constant 72 : index
    %27 = vector.load %arg1[%c0_16, %c0_17, %c72] : memref<1x8x96xbf16, #tpu.memory_space<vmem>>, vector<1x8x8xbf16>
    %28 = vector.shape_cast %27 : vector<1x8x8xbf16> to vector<8x8xbf16>
    %cst_18 = arith.constant dense<0.000000e+00> : vector<8x8xf32>
    %29 = tpu.matmul %24, %26, %cst_18 {dimension_numbers = #tpu.dot_dimension_numbers<[1], [1], [0], [0], [0, 0, 1, 0], [], []>} : vector<8x8xbf16>, vector<8x8xbf16>, vector<8x8xf32> -> vector<8x8xf32>
    %cst_19 = arith.constant dense<0xFF800000> : vector<8xf32>
    %30 = vector.multi_reduction <maximumf>, %29, %cst_19 [1] : vector<8x8xf32> to vector<8xf32>
    %31 = vector.shape_cast %30 : vector<8xf32> to vector<8x1xf32>
    %32 = vector.broadcast %31 : vector<8x1xf32> to vector<8x8xf32>
    %33 = arith.subf %29, %32 : vector<8x8xf32>
    %34 = math.exp %33 : vector<8x8xf32>
    %cst_20 = arith.constant dense<0.000000e+00> : vector<8xf32>
    %35 = vector.multi_reduction <add>, %34, %cst_20 [1] : vector<8x8xf32> to vector<8xf32>
    %36 = vector.shape_cast %35 : vector<8xf32> to vector<8x1xf32>
    %37 = tpu.reciprocal %36 {approx = true} : vector<8x1xf32> -> vector<8x1xf32>
    %38 = vector.broadcast %37 : vector<8x1xf32> to vector<8x8xf32>
    %39 = arith.mulf %34, %38 : vector<8x8xf32>
    %40 = arith.truncf %39 : vector<8x8xf32> to vector<8x8xbf16>
    %cst_21 = arith.constant dense<0.000000e+00> : vector<8x8xf32>
    %41 = tpu.matmul %40, %28, %cst_21 {dimension_numbers = #tpu.dot_dimension_numbers<[1], [0], [0], [1], [0, 0, 1, 1], [], []>} : vector<8x8xbf16>, vector<8x8xbf16>, vector<8x8xf32> -> vector<8x8xf32>
    %42 = arith.truncf %41 : vector<8x8xf32> to vector<8x8xbf16>
    %c0_22 = arith.constant 0 : index
    %c0_23 = arith.constant 0 : index
    %c8_24 = arith.constant 8 : index
    %43 = vector.load %arg2[%c0_22, %c0_23, %c8_24] : memref<1x8x32xbf16, #tpu.memory_space<vmem>>, vector<1x8x8xbf16>
    %44 = vector.shape_cast %43 : vector<1x8x8xbf16> to vector<8x8xbf16>
    %45 = vector.shape_cast %42 : vector<8x8xbf16> to vector<1x8x8xbf16>
    tpu.vector_store %arg2[%c0_22, %c0_23, %c8_24], %45 {strides = array<i32>} : memref<1x8x32xbf16, #tpu.memory_space<vmem>>, vector<1x8x8xbf16>,
    %c0_25 = arith.constant 0 : index
    %c0_26 = arith.constant 0 : index
    %c16 = arith.constant 16 : index
    %46 = vector.load %arg1[%c0_25, %c0_26, %c16] : memref<1x8x96xbf16, #tpu.memory_space<vmem>>, vector<1x8x8xbf16>
    %47 = vector.shape_cast %46 : vector<1x8x8xbf16> to vector<8x8xbf16>
    %c0_27 = arith.constant 0 : index
    %c0_28 = arith.constant 0 : index
    %c48 = arith.constant 48 : index
    %48 = vector.load %arg1[%c0_27, %c0_28, %c48] : memref<1x8x96xbf16, #tpu.memory_space<vmem>>, vector<1x8x8xbf16>
    %49 = vector.shape_cast %48 : vector<1x8x8xbf16> to vector<8x8xbf16>
    %c0_29 = arith.constant 0 : index
    %c0_30 = arith.constant 0 : index
    %c80 = arith.constant 80 : index
    %50 = vector.load %arg1[%c0_29, %c0_30, %c80] : memref<1x8x96xbf16, #tpu.memory_space<vmem>>, vector<1x8x8xbf16>
    %51 = vector.shape_cast %50 : vector<1x8x8xbf16> to vector<8x8xbf16>
    %cst_31 = arith.constant dense<0.000000e+00> : vector<8x8xf32>
    %52 = tpu.matmul %47, %49, %cst_31 {dimension_numbers = #tpu.dot_dimension_numbers<[1], [1], [0], [0], [0, 0, 1, 0], [], []>} : vector<8x8xbf16>, vector<8x8xbf16>, vector<8x8xf32> -> vector<8x8xf32>
    %cst_32 = arith.constant dense<0xFF800000> : vector<8xf32>
    %53 = vector.multi_reduction <maximumf>, %52, %cst_32 [1] : vector<8x8xf32> to vector<8xf32>
    %54 = vector.shape_cast %53 : vector<8xf32> to vector<8x1xf32>
    %55 = vector.broadcast %54 : vector<8x1xf32> to vector<8x8xf32>
    %56 = arith.subf %52, %55 : vector<8x8xf32>
    %57 = math.exp %56 : vector<8x8xf32>
    %cst_33 = arith.constant dense<0.000000e+00> : vector<8xf32>
    %58 = vector.multi_reduction <add>, %57, %cst_33 [1] : vector<8x8xf32> to vector<8xf32>
    %59 = vector.shape_cast %58 : vector<8xf32> to vector<8x1xf32>
    %60 = tpu.reciprocal %59 {approx = true} : vector<8x1xf32> -> vector<8x1xf32>
    %61 = vector.broadcast %60 : vector<8x1xf32> to vector<8x8xf32>
    %62 = arith.mulf %57, %61 : vector<8x8xf32>
    %63 = arith.truncf %62 : vector<8x8xf32> to vector<8x8xbf16>
    %cst_34 = arith.constant dense<0.000000e+00> : vector<8x8xf32>
    %64 = tpu.matmul %63, %51, %cst_34 {dimension_numbers = #tpu.dot_dimension_numbers<[1], [0], [0], [1], [0, 0, 1, 1], [], []>} : vector<8x8xbf16>, vector<8x8xbf16>, vector<8x8xf32> -> vector<8x8xf32>
    %65 = arith.truncf %64 : vector<8x8xf32> to vector<8x8xbf16>
    %c0_35 = arith.constant 0 : index
    %c0_36 = arith.constant 0 : index
    %c16_37 = arith.constant 16 : index
    %66 = vector.load %arg2[%c0_35, %c0_36, %c16_37] : memref<1x8x32xbf16, #tpu.memory_space<vmem>>, vector<1x8x8xbf16>
    %67 = vector.shape_cast %66 : vector<1x8x8xbf16> to vector<8x8xbf16>
    %68 = vector.shape_cast %65 : vector<8x8xbf16> to vector<1x8x8xbf16>
    tpu.vector_store %arg2[%c0_35, %c0_36, %c16_37], %68 {strides = array<i32>} : memref<1x8x32xbf16, #tpu.memory_space<vmem>>, vector<1x8x8xbf16>,
    %c0_38 = arith.constant 0 : index
    %c0_39 = arith.constant 0 : index
    %c24 = arith.constant 24 : index
    %69 = vector.load %arg1[%c0_38, %c0_39, %c24] : memref<1x8x96xbf16, #tpu.memory_space<vmem>>, vector<1x8x8xbf16>
    %70 = vector.shape_cast %69 : vector<1x8x8xbf16> to vector<8x8xbf16>
    %c0_40 = arith.constant 0 : index
    %c0_41 = arith.constant 0 : index
    %c56 = arith.constant 56 : index
    %71 = vector.load %arg1[%c0_40, %c0_41, %c56] : memref<1x8x96xbf16, #tpu.memory_space<vmem>>, vector<1x8x8xbf16>
    %72 = vector.shape_cast %71 : vector<1x8x8xbf16> to vector<8x8xbf16>
    %c0_42 = arith.constant 0 : index
    %c0_43 = arith.constant 0 : index
    %c88 = arith.constant 88 : index
    %73 = vector.load %arg1[%c0_42, %c0_43, %c88] : memref<1x8x96xbf16, #tpu.memory_space<vmem>>, vector<1x8x8xbf16>
    %74 = vector.shape_cast %73 : vector<1x8x8xbf16> to vector<8x8xbf16>
    %cst_44 = arith.constant dense<0.000000e+00> : vector<8x8xf32>
    %75 = tpu.matmul %70, %72, %cst_44 {dimension_numbers = #tpu.dot_dimension_numbers<[1], [1], [0], [0], [0, 0, 1, 0], [], []>} : vector<8x8xbf16>, vector<8x8xbf16>, vector<8x8xf32> -> vector<8x8xf32>
    %cst_45 = arith.constant dense<0xFF800000> : vector<8xf32>
    %76 = vector.multi_reduction <maximumf>, %75, %cst_45 [1] : vector<8x8xf32> to vector<8xf32>
    %77 = vector.shape_cast %76 : vector<8xf32> to vector<8x1xf32>
    %78 = vector.broadcast %77 : vector<8x1xf32> to vector<8x8xf32>
    %79 = arith.subf %75, %78 : vector<8x8xf32>
    %80 = math.exp %79 : vector<8x8xf32>
    %cst_46 = arith.constant dense<0.000000e+00> : vector<8xf32>
    %81 = vector.multi_reduction <add>, %80, %cst_46 [1] : vector<8x8xf32> to vector<8xf32>
    %82 = vector.shape_cast %81 : vector<8xf32> to vector<8x1xf32>
    %83 = tpu.reciprocal %82 {approx = true} : vector<8x1xf32> -> vector<8x1xf32>
    %84 = vector.broadcast %83 : vector<8x1xf32> to vector<8x8xf32>
    %85 = arith.mulf %80, %84 : vector<8x8xf32>
    %86 = arith.truncf %85 : vector<8x8xf32> to vector<8x8xbf16>
    %cst_47 = arith.constant dense<0.000000e+00> : vector<8x8xf32>
    %87 = tpu.matmul %86, %74, %cst_47 {dimension_numbers = #tpu.dot_dimension_numbers<[1], [0], [0], [1], [0, 0, 1, 1], [], []>} : vector<8x8xbf16>, vector<8x8xbf16>, vector<8x8xf32> -> vector<8x8xf32>
    %88 = arith.truncf %87 : vector<8x8xf32> to vector<8x8xbf16>
    %c0_48 = arith.constant 0 : index
    %c0_49 = arith.constant 0 : index
    %c24_50 = arith.constant 24 : index
    %89 = vector.load %arg2[%c0_48, %c0_49, %c24_50] : memref<1x8x32xbf16, #tpu.memory_space<vmem>>, vector<1x8x8xbf16>
    %90 = vector.shape_cast %89 : vector<1x8x8xbf16> to vector<8x8xbf16>
    %91 = vector.shape_cast %88 : vector<8x8xbf16> to vector<1x8x8xbf16>
    tpu.vector_store %arg2[%c0_48, %c0_49, %c24_50], %91 {strides = array<i32>} : memref<1x8x32xbf16, #tpu.memory_space<vmem>>, vector<1x8x8xbf16>,
    return
  }
  func.func @transform_0(%arg0: i32) -> (i32, i32, i32) {
    %c0_i32 = arith.constant 0 : i32
    %c0_i32_0 = arith.constant 0 : i32
    %c0_i32_1 = arith.constant 0 : i32
    return %arg0, %c0_i32, %c0_i32_0 : i32, i32, i32
  }
  func.func @transform_1(%arg0: i32) -> (i32, i32, i32) {
    %c0_i32 = arith.constant 0 : i32
    %c0_i32_0 = arith.constant 0 : i32
    %c0_i32_1 = arith.constant 0 : i32
    return %arg0, %c0_i32, %c0_i32_0 : i32, i32, i32
  }
}

module attributes {stable_mosaic.version = 11 : i64} {
  func.func @_matmul_bias_kernel(%arg0: i32, %arg1: i32, %arg2: i32, %arg3: memref<16x32xbf16, #tpu.memory_space<vmem>>, %arg4: memref<32x96xbf16, #tpu.memory_space<vmem>>, %arg5: memref<1x96xf32, #tpu.memory_space<vmem>>, %arg6: memref<16x96xbf16, #tpu.memory_space<vmem>>, %arg7: memref<16x96xf32, #tpu.memory_space<vmem>>) attributes {dimension_semantics = [#tpu.dimension_semantics<parallel>, #tpu.dimension_semantics<parallel>, #tpu.dimension_semantics<arbitrary>], iteration_bounds = array<i64: 1, 1, 1>, scalar_prefetch = 0 : i64, scratch_operands = 1 : i64, tpu.core_type = #tpu.core_type<tc>, window_params = [{transform_indices = @transform_0, window_bounds = array<i64: 16, 32>}, {transform_indices = @transform_1, window_bounds = array<i64: 32, 96>}, {transform_indices = @transform_2, window_bounds = array<i64: 1, 96>}, {transform_indices = @transform_3, window_bounds = array<i64: 16, 96>}]} {
    %c0_i32 = arith.constant 0 : i32
    %0 = arith.cmpi eq, %arg2, %c0_i32 : i32
    %1 = arith.extui %0 : i1 to i32
    %c0_i32_0 = arith.constant 0 : i32
    %2 = arith.cmpi ne, %1, %c0_i32_0 : i32
    scf.if %2 {
      %cst_10 = arith.constant 0.000000e+00 : f32
      %12 = vector.broadcast %cst_10 : f32 to vector<16x96xf32>
      %c0_11 = arith.constant 0 : index
      %c0_12 = arith.constant 0 : index
      %13 = vector.load %arg7[%c0_11, %c0_12] : memref<16x96xf32, #tpu.memory_space<vmem>>, vector<16x96xf32>
      tpu.vector_store %arg7[%c0_11, %c0_12], %12 {strides = array<i32>} : memref<16x96xf32, #tpu.memory_space<vmem>>, vector<16x96xf32>,
    } else {
    }
    %c0 = arith.constant 0 : index
    %c0_1 = arith.constant 0 : index
    %3 = vector.load %arg7[%c0, %c0_1] : memref<16x96xf32, #tpu.memory_space<vmem>>, vector<16x96xf32>
    %c0_2 = arith.constant 0 : index
    %c0_3 = arith.constant 0 : index
    %4 = vector.load %arg3[%c0_2, %c0_3] : memref<16x32xbf16, #tpu.memory_space<vmem>>, vector<16x32xbf16>
    %c0_4 = arith.constant 0 : index
    %c0_5 = arith.constant 0 : index
    %5 = vector.load %arg4[%c0_4, %c0_5] : memref<32x96xbf16, #tpu.memory_space<vmem>>, vector<32x96xbf16>
    %cst = arith.constant dense<0.000000e+00> : vector<16x96xf32>
    %6 = tpu.matmul %4, %5, %cst {dimension_numbers = #tpu.dot_dimension_numbers<[1], [0], [0], [1], [0, 0, 1, 1], [], []>} : vector<16x32xbf16>, vector<32x96xbf16>, vector<16x96xf32> -> vector<16x96xf32>
    %7 = arith.addf %3, %6 : vector<16x96xf32>
    %c0_6 = arith.constant 0 : index
    %c0_7 = arith.constant 0 : index
    %8 = vector.load %arg7[%c0_6, %c0_7] : memref<16x96xf32, #tpu.memory_space<vmem>>, vector<16x96xf32>
    tpu.vector_store %arg7[%c0_6, %c0_7], %7 {strides = array<i32>} : memref<16x96xf32, #tpu.memory_space<vmem>>, vector<16x96xf32>,
    %c0_i32_8 = arith.constant 0 : i32
    %9 = arith.cmpi eq, %arg2, %c0_i32_8 : i32
    %10 = arith.extui %9 : i1 to i32
    %c0_i32_9 = arith.constant 0 : i32
    %11 = arith.cmpi ne, %10, %c0_i32_9 : i32
    scf.if %11 {
      %c0_10 = arith.constant 0 : index
      %c0_11 = arith.constant 0 : index
      %12 = vector.load %arg7[%c0_10, %c0_11] : memref<16x96xf32, #tpu.memory_space<vmem>>, vector<16x96xf32>
      %c0_12 = arith.constant 0 : index
      %c0_13 = arith.constant 0 : index
      %13 = vector.load %arg5[%c0_12, %c0_13] : memref<1x96xf32, #tpu.memory_space<vmem>>, vector<1x96xf32>
      %14 = vector.broadcast %13 : vector<1x96xf32> to vector<16x96xf32>
      %15 = arith.addf %12, %14 : vector<16x96xf32>
      %16 = arith.truncf %15 : vector<16x96xf32> to vector<16x96xbf16>
      %c0_14 = arith.constant 0 : index
      %c0_15 = arith.constant 0 : index
      %17 = vector.load %arg6[%c0_14, %c0_15] : memref<16x96xbf16, #tpu.memory_space<vmem>>, vector<16x96xbf16>
      tpu.vector_store %arg6[%c0_14, %c0_15], %16 {strides = array<i32>} : memref<16x96xbf16, #tpu.memory_space<vmem>>, vector<16x96xbf16>,
    } else {
    }
    return
  }
  func.func @transform_0(%arg0: i32, %arg1: i32, %arg2: i32) -> (i32, i32) {
    %c0_i32 = arith.constant 0 : i32
    return %arg0, %arg2 : i32, i32
  }
  func.func @transform_1(%arg0: i32, %arg1: i32, %arg2: i32) -> (i32, i32) {
    %c0_i32 = arith.constant 0 : i32
    return %arg2, %arg1 : i32, i32
  }
  func.func @transform_2(%arg0: i32, %arg1: i32, %arg2: i32) -> (i32, i32) {
    %c0_i32 = arith.constant 0 : i32
    %c0_i32_0 = arith.constant 0 : i32
    return %c0_i32, %arg1 : i32, i32
  }
  func.func @transform_3(%arg0: i32, %arg1: i32, %arg2: i32) -> (i32, i32) {
    %c0_i32 = arith.constant 0 : i32
    return %arg0, %arg1 : i32, i32
  }
}

module attributes {stable_mosaic.version = 11 : i64} {
  func.func @_proj_add_ln_kernel(%arg0: i32, %arg1: i32, %arg2: memref<16x32xbf16, #tpu.memory_space<vmem>>, %arg3: memref<32x32xbf16, #tpu.memory_space<vmem>>, %arg4: memref<1x32xf32, #tpu.memory_space<vmem>>, %arg5: memref<16x32xf32, #tpu.memory_space<vmem>>, %arg6: memref<1x32xf32, #tpu.memory_space<vmem>>, %arg7: memref<1x32xf32, #tpu.memory_space<vmem>>, %arg8: memref<16x32xbf16, #tpu.memory_space<vmem>>, %arg9: memref<16x32xf32, #tpu.memory_space<vmem>>) attributes {dimension_semantics = [#tpu.dimension_semantics<parallel>, #tpu.dimension_semantics<arbitrary>], iteration_bounds = array<i64: 1, 1>, scalar_prefetch = 0 : i64, scratch_operands = 1 : i64, tpu.core_type = #tpu.core_type<tc>, window_params = [{transform_indices = @transform_0, window_bounds = array<i64: 16, 32>}, {transform_indices = @transform_1, window_bounds = array<i64: 32, 32>}, {pipeline_mode = #tpu.pipeline_mode<synchronous>, transform_indices = @transform_2, window_bounds = array<i64: 1, 32>}, {transform_indices = @transform_3, window_bounds = array<i64: 16, 32>}, {pipeline_mode = #tpu.pipeline_mode<synchronous>, transform_indices = @transform_4, window_bounds = array<i64: 1, 32>}, {pipeline_mode = #tpu.pipeline_mode<synchronous>, transform_indices = @transform_5, window_bounds = array<i64: 1, 32>}, {transform_indices = @transform_6, window_bounds = array<i64: 16, 32>}]} {
    %c0_i32 = arith.constant 0 : i32
    %0 = arith.cmpi eq, %arg1, %c0_i32 : i32
    %1 = arith.extui %0 : i1 to i32
    %c0_i32_0 = arith.constant 0 : i32
    %2 = arith.cmpi ne, %1, %c0_i32_0 : i32
    scf.if %2 {
      %cst_10 = arith.constant 0.000000e+00 : f32
      %12 = vector.broadcast %cst_10 : f32 to vector<16x32xf32>
      %c0_11 = arith.constant 0 : index
      %c0_12 = arith.constant 0 : index
      %13 = vector.load %arg9[%c0_11, %c0_12] : memref<16x32xf32, #tpu.memory_space<vmem>>, vector<16x32xf32>
      tpu.vector_store %arg9[%c0_11, %c0_12], %12 {strides = array<i32>} : memref<16x32xf32, #tpu.memory_space<vmem>>, vector<16x32xf32>,
    } else {
    }
    %c0 = arith.constant 0 : index
    %c0_1 = arith.constant 0 : index
    %3 = vector.load %arg9[%c0, %c0_1] : memref<16x32xf32, #tpu.memory_space<vmem>>, vector<16x32xf32>
    %c0_2 = arith.constant 0 : index
    %c0_3 = arith.constant 0 : index
    %4 = vector.load %arg2[%c0_2, %c0_3] : memref<16x32xbf16, #tpu.memory_space<vmem>>, vector<16x32xbf16>
    %c0_4 = arith.constant 0 : index
    %c0_5 = arith.constant 0 : index
    %5 = vector.load %arg3[%c0_4, %c0_5] : memref<32x32xbf16, #tpu.memory_space<vmem>>, vector<32x32xbf16>
    %cst = arith.constant dense<0.000000e+00> : vector<16x32xf32>
    %6 = tpu.matmul %4, %5, %cst {dimension_numbers = #tpu.dot_dimension_numbers<[1], [0], [0], [1], [0, 0, 1, 1], [], []>} : vector<16x32xbf16>, vector<32x32xbf16>, vector<16x32xf32> -> vector<16x32xf32>
    %7 = arith.addf %3, %6 : vector<16x32xf32>
    %c0_6 = arith.constant 0 : index
    %c0_7 = arith.constant 0 : index
    %8 = vector.load %arg9[%c0_6, %c0_7] : memref<16x32xf32, #tpu.memory_space<vmem>>, vector<16x32xf32>
    tpu.vector_store %arg9[%c0_6, %c0_7], %7 {strides = array<i32>} : memref<16x32xf32, #tpu.memory_space<vmem>>, vector<16x32xf32>,
    %c0_i32_8 = arith.constant 0 : i32
    %9 = arith.cmpi eq, %arg1, %c0_i32_8 : i32
    %10 = arith.extui %9 : i1 to i32
    %c0_i32_9 = arith.constant 0 : i32
    %11 = arith.cmpi ne, %10, %c0_i32_9 : i32
    scf.if %11 {
      %c0_10 = arith.constant 0 : index
      %c0_11 = arith.constant 0 : index
      %12 = vector.load %arg9[%c0_10, %c0_11] : memref<16x32xf32, #tpu.memory_space<vmem>>, vector<16x32xf32>
      %c0_12 = arith.constant 0 : index
      %c0_13 = arith.constant 0 : index
      %13 = vector.load %arg4[%c0_12, %c0_13] : memref<1x32xf32, #tpu.memory_space<vmem>>, vector<1x32xf32>
      %14 = vector.broadcast %13 : vector<1x32xf32> to vector<16x32xf32>
      %15 = arith.addf %12, %14 : vector<16x32xf32>
      %c0_14 = arith.constant 0 : index
      %c0_15 = arith.constant 0 : index
      %16 = vector.load %arg5[%c0_14, %c0_15] : memref<16x32xf32, #tpu.memory_space<vmem>>, vector<16x32xf32>
      %17 = arith.addf %15, %16 : vector<16x32xf32>
      %cst_16 = arith.constant dense<0.000000e+00> : vector<16xf32>
      %18 = vector.multi_reduction <add>, %17, %cst_16 [1] : vector<16x32xf32> to vector<16xf32>
      %19 = vector.shape_cast %18 : vector<16xf32> to vector<16x1xf32>
      %cst_17 = arith.constant 3.200000e+01 : f32
      %20 = vector.broadcast %cst_17 : f32 to vector<16x1xf32>
      %21 = arith.divf %19, %20 : vector<16x1xf32>
      %22 = vector.broadcast %21 : vector<16x1xf32> to vector<16x32xf32>
      %23 = arith.subf %17, %22 : vector<16x32xf32>
      %24 = arith.mulf %23, %23 : vector<16x32xf32>
      %cst_18 = arith.constant dense<0.000000e+00> : vector<16xf32>
      %25 = vector.multi_reduction <add>, %24, %cst_18 [1] : vector<16x32xf32> to vector<16xf32>
      %26 = vector.shape_cast %25 : vector<16xf32> to vector<16x1xf32>
      %cst_19 = arith.constant 3.200000e+01 : f32
      %27 = vector.broadcast %cst_19 : f32 to vector<16x1xf32>
      %28 = arith.divf %26, %27 : vector<16x1xf32>
      %cst_20 = arith.constant 9.99999974E-6 : f32
      %29 = vector.broadcast %cst_20 : f32 to vector<16x1xf32>
      %30 = arith.addf %28, %29 : vector<16x1xf32>
      %31 = math.rsqrt %30 : vector<16x1xf32>
      %32 = vector.broadcast %31 : vector<16x1xf32> to vector<16x32xf32>
      %33 = arith.mulf %23, %32 : vector<16x32xf32>
      %c0_21 = arith.constant 0 : index
      %c0_22 = arith.constant 0 : index
      %34 = vector.load %arg6[%c0_21, %c0_22] : memref<1x32xf32, #tpu.memory_space<vmem>>, vector<1x32xf32>
      %35 = vector.broadcast %34 : vector<1x32xf32> to vector<16x32xf32>
      %36 = arith.mulf %33, %35 : vector<16x32xf32>
      %c0_23 = arith.constant 0 : index
      %c0_24 = arith.constant 0 : index
      %37 = vector.load %arg7[%c0_23, %c0_24] : memref<1x32xf32, #tpu.memory_space<vmem>>, vector<1x32xf32>
      %38 = vector.broadcast %37 : vector<1x32xf32> to vector<16x32xf32>
      %39 = arith.addf %36, %38 : vector<16x32xf32>
      %40 = arith.truncf %39 : vector<16x32xf32> to vector<16x32xbf16>
      %c0_25 = arith.constant 0 : index
      %c0_26 = arith.constant 0 : index
      %41 = vector.load %arg8[%c0_25, %c0_26] : memref<16x32xbf16, #tpu.memory_space<vmem>>, vector<16x32xbf16>
      tpu.vector_store %arg8[%c0_25, %c0_26], %40 {strides = array<i32>} : memref<16x32xbf16, #tpu.memory_space<vmem>>, vector<16x32xbf16>,
    } else {
    }
    return
  }
  func.func @transform_0(%arg0: i32, %arg1: i32) -> (i32, i32) {
    %c0_i32 = arith.constant 0 : i32
    return %arg0, %arg1 : i32, i32
  }
  func.func @transform_1(%arg0: i32, %arg1: i32) -> (i32, i32) {
    %c0_i32 = arith.constant 0 : i32
    %c0_i32_0 = arith.constant 0 : i32
    return %arg1, %c0_i32 : i32, i32
  }
  func.func @transform_2(%arg0: i32, %arg1: i32) -> (i32, i32) {
    %c0_i32 = arith.constant 0 : i32
    %c0_i32_0 = arith.constant 0 : i32
    %c0_i32_1 = arith.constant 0 : i32
    return %c0_i32, %c0_i32_0 : i32, i32
  }
  func.func @transform_3(%arg0: i32, %arg1: i32) -> (i32, i32) {
    %c0_i32 = arith.constant 0 : i32
    %c0_i32_0 = arith.constant 0 : i32
    return %arg0, %c0_i32 : i32, i32
  }
  func.func @transform_4(%arg0: i32, %arg1: i32) -> (i32, i32) {
    %c0_i32 = arith.constant 0 : i32
    %c0_i32_0 = arith.constant 0 : i32
    %c0_i32_1 = arith.constant 0 : i32
    return %c0_i32, %c0_i32_0 : i32, i32
  }
  func.func @transform_5(%arg0: i32, %arg1: i32) -> (i32, i32) {
    %c0_i32 = arith.constant 0 : i32
    %c0_i32_0 = arith.constant 0 : i32
    %c0_i32_1 = arith.constant 0 : i32
    return %c0_i32, %c0_i32_0 : i32, i32
  }
  func.func @transform_6(%arg0: i32, %arg1: i32) -> (i32, i32) {
    %c0_i32 = arith.constant 0 : i32
    %c0_i32_0 = arith.constant 0 : i32
    return %arg0, %c0_i32 : i32, i32
  }
}

module attributes {stable_mosaic.version = 11 : i64} {
  func.func @_proj_add_ln_kernel(%arg0: i32, %arg1: i32, %arg2: memref<16x32xbf16, #tpu.memory_space<vmem>>, %arg3: memref<32x32xbf16, #tpu.memory_space<vmem>>, %arg4: memref<1x32xf32, #tpu.memory_space<vmem>>, %arg5: memref<16x32xbf16, #tpu.memory_space<vmem>>, %arg6: memref<1x32xf32, #tpu.memory_space<vmem>>, %arg7: memref<1x32xf32, #tpu.memory_space<vmem>>, %arg8: memref<16x32xbf16, #tpu.memory_space<vmem>>, %arg9: memref<16x32xf32, #tpu.memory_space<vmem>>) attributes {dimension_semantics = [#tpu.dimension_semantics<parallel>, #tpu.dimension_semantics<arbitrary>], iteration_bounds = array<i64: 1, 1>, scalar_prefetch = 0 : i64, scratch_operands = 1 : i64, tpu.core_type = #tpu.core_type<tc>, window_params = [{transform_indices = @transform_0, window_bounds = array<i64: 16, 32>}, {transform_indices = @transform_1, window_bounds = array<i64: 32, 32>}, {pipeline_mode = #tpu.pipeline_mode<synchronous>, transform_indices = @transform_2, window_bounds = array<i64: 1, 32>}, {transform_indices = @transform_3, window_bounds = array<i64: 16, 32>}, {pipeline_mode = #tpu.pipeline_mode<synchronous>, transform_indices = @transform_4, window_bounds = array<i64: 1, 32>}, {pipeline_mode = #tpu.pipeline_mode<synchronous>, transform_indices = @transform_5, window_bounds = array<i64: 1, 32>}, {transform_indices = @transform_6, window_bounds = array<i64: 16, 32>}]} {
    %c0_i32 = arith.constant 0 : i32
    %0 = arith.cmpi eq, %arg1, %c0_i32 : i32
    %1 = arith.extui %0 : i1 to i32
    %c0_i32_0 = arith.constant 0 : i32
    %2 = arith.cmpi ne, %1, %c0_i32_0 : i32
    scf.if %2 {
      %cst_10 = arith.constant 0.000000e+00 : f32
      %12 = vector.broadcast %cst_10 : f32 to vector<16x32xf32>
      %c0_11 = arith.constant 0 : index
      %c0_12 = arith.constant 0 : index
      %13 = vector.load %arg9[%c0_11, %c0_12] : memref<16x32xf32, #tpu.memory_space<vmem>>, vector<16x32xf32>
      tpu.vector_store %arg9[%c0_11, %c0_12], %12 {strides = array<i32>} : memref<16x32xf32, #tpu.memory_space<vmem>>, vector<16x32xf32>,
    } else {
    }
    %c0 = arith.constant 0 : index
    %c0_1 = arith.constant 0 : index
    %3 = vector.load %arg9[%c0, %c0_1] : memref<16x32xf32, #tpu.memory_space<vmem>>, vector<16x32xf32>
    %c0_2 = arith.constant 0 : index
    %c0_3 = arith.constant 0 : index
    %4 = vector.load %arg2[%c0_2, %c0_3] : memref<16x32xbf16, #tpu.memory_space<vmem>>, vector<16x32xbf16>
    %c0_4 = arith.constant 0 : index
    %c0_5 = arith.constant 0 : index
    %5 = vector.load %arg3[%c0_4, %c0_5] : memref<32x32xbf16, #tpu.memory_space<vmem>>, vector<32x32xbf16>
    %cst = arith.constant dense<0.000000e+00> : vector<16x32xf32>
    %6 = tpu.matmul %4, %5, %cst {dimension_numbers = #tpu.dot_dimension_numbers<[1], [0], [0], [1], [0, 0, 1, 1], [], []>} : vector<16x32xbf16>, vector<32x32xbf16>, vector<16x32xf32> -> vector<16x32xf32>
    %7 = arith.addf %3, %6 : vector<16x32xf32>
    %c0_6 = arith.constant 0 : index
    %c0_7 = arith.constant 0 : index
    %8 = vector.load %arg9[%c0_6, %c0_7] : memref<16x32xf32, #tpu.memory_space<vmem>>, vector<16x32xf32>
    tpu.vector_store %arg9[%c0_6, %c0_7], %7 {strides = array<i32>} : memref<16x32xf32, #tpu.memory_space<vmem>>, vector<16x32xf32>,
    %c0_i32_8 = arith.constant 0 : i32
    %9 = arith.cmpi eq, %arg1, %c0_i32_8 : i32
    %10 = arith.extui %9 : i1 to i32
    %c0_i32_9 = arith.constant 0 : i32
    %11 = arith.cmpi ne, %10, %c0_i32_9 : i32
    scf.if %11 {
      %c0_10 = arith.constant 0 : index
      %c0_11 = arith.constant 0 : index
      %12 = vector.load %arg9[%c0_10, %c0_11] : memref<16x32xf32, #tpu.memory_space<vmem>>, vector<16x32xf32>
      %c0_12 = arith.constant 0 : index
      %c0_13 = arith.constant 0 : index
      %13 = vector.load %arg4[%c0_12, %c0_13] : memref<1x32xf32, #tpu.memory_space<vmem>>, vector<1x32xf32>
      %14 = vector.broadcast %13 : vector<1x32xf32> to vector<16x32xf32>
      %15 = arith.addf %12, %14 : vector<16x32xf32>
      %c0_14 = arith.constant 0 : index
      %c0_15 = arith.constant 0 : index
      %16 = vector.load %arg5[%c0_14, %c0_15] : memref<16x32xbf16, #tpu.memory_space<vmem>>, vector<16x32xbf16>
      %17 = arith.extf %16 : vector<16x32xbf16> to vector<16x32xf32>
      %18 = arith.addf %15, %17 : vector<16x32xf32>
      %cst_16 = arith.constant dense<0.000000e+00> : vector<16xf32>
      %19 = vector.multi_reduction <add>, %18, %cst_16 [1] : vector<16x32xf32> to vector<16xf32>
      %20 = vector.shape_cast %19 : vector<16xf32> to vector<16x1xf32>
      %cst_17 = arith.constant 3.200000e+01 : f32
      %21 = vector.broadcast %cst_17 : f32 to vector<16x1xf32>
      %22 = arith.divf %20, %21 : vector<16x1xf32>
      %23 = vector.broadcast %22 : vector<16x1xf32> to vector<16x32xf32>
      %24 = arith.subf %18, %23 : vector<16x32xf32>
      %25 = arith.mulf %24, %24 : vector<16x32xf32>
      %cst_18 = arith.constant dense<0.000000e+00> : vector<16xf32>
      %26 = vector.multi_reduction <add>, %25, %cst_18 [1] : vector<16x32xf32> to vector<16xf32>
      %27 = vector.shape_cast %26 : vector<16xf32> to vector<16x1xf32>
      %cst_19 = arith.constant 3.200000e+01 : f32
      %28 = vector.broadcast %cst_19 : f32 to vector<16x1xf32>
      %29 = arith.divf %27, %28 : vector<16x1xf32>
      %cst_20 = arith.constant 9.99999974E-6 : f32
      %30 = vector.broadcast %cst_20 : f32 to vector<16x1xf32>
      %31 = arith.addf %29, %30 : vector<16x1xf32>
      %32 = math.rsqrt %31 : vector<16x1xf32>
      %33 = vector.broadcast %32 : vector<16x1xf32> to vector<16x32xf32>
      %34 = arith.mulf %24, %33 : vector<16x32xf32>
      %c0_21 = arith.constant 0 : index
      %c0_22 = arith.constant 0 : index
      %35 = vector.load %arg6[%c0_21, %c0_22] : memref<1x32xf32, #tpu.memory_space<vmem>>, vector<1x32xf32>
      %36 = vector.broadcast %35 : vector<1x32xf32> to vector<16x32xf32>
      %37 = arith.mulf %34, %36 : vector<16x32xf32>
      %c0_23 = arith.constant 0 : index
      %c0_24 = arith.constant 0 : index
      %38 = vector.load %arg7[%c0_23, %c0_24] : memref<1x32xf32, #tpu.memory_space<vmem>>, vector<1x32xf32>
      %39 = vector.broadcast %38 : vector<1x32xf32> to vector<16x32xf32>
      %40 = arith.addf %37, %39 : vector<16x32xf32>
      %41 = arith.truncf %40 : vector<16x32xf32> to vector<16x32xbf16>
      %c0_25 = arith.constant 0 : index
      %c0_26 = arith.constant 0 : index
      %42 = vector.load %arg8[%c0_25, %c0_26] : memref<16x32xbf16, #tpu.memory_space<vmem>>, vector<16x32xbf16>
      tpu.vector_store %arg8[%c0_25, %c0_26], %41 {strides = array<i32>} : memref<16x32xbf16, #tpu.memory_space<vmem>>, vector<16x32xbf16>,
    } else {
    }
    return
  }
  func.func @transform_0(%arg0: i32, %arg1: i32) -> (i32, i32) {
    %c0_i32 = arith.constant 0 : i32
    return %arg0, %arg1 : i32, i32
  }
  func.func @transform_1(%arg0: i32, %arg1: i32) -> (i32, i32) {
    %c0_i32 = arith.constant 0 : i32
    %c0_i32_0 = arith.constant 0 : i32
    return %arg1, %c0_i32 : i32, i32
  }
  func.func @transform_2(%arg0: i32, %arg1: i32) -> (i32, i32) {
    %c0_i32 = arith.constant 0 : i32
    %c0_i32_0 = arith.constant 0 : i32
    %c0_i32_1 = arith.constant 0 : i32
    return %c0_i32, %c0_i32_0 : i32, i32
  }
  func.func @transform_3(%arg0: i32, %arg1: i32) -> (i32, i32) {
    %c0_i32 = arith.constant 0 : i32
    %c0_i32_0 = arith.constant 0 : i32
    return %arg0, %c0_i32 : i32, i32
  }
  func.func @transform_4(%arg0: i32, %arg1: i32) -> (i32, i32) {
    %c0_i32 = arith.constant 0 : i32
    %c0_i32_0 = arith.constant 0 : i32
    %c0_i32_1 = arith.constant 0 : i32
    return %c0_i32, %c0_i32_0 : i32, i32
  }
  func.func @transform_5(%arg0: i32, %arg1: i32) -> (i32, i32) {
    %c0_i32 = arith.constant 0 : i32
    %c0_i32_0 = arith.constant 0 : i32
    %c0_i32_1 = arith.constant 0 : i32
    return %c0_i32, %c0_i32_0 : i32, i32
  }
  func.func @transform_6(%arg0: i32, %arg1: i32) -> (i32, i32) {
    %c0_i32 = arith.constant 0 : i32
    %c0_i32_0 = arith.constant 0 : i32
    return %arg0, %c0_i32 : i32, i32
  }
}

module attributes {stable_mosaic.version = 11 : i64} {
  func.func @_ffn_add_ln_kernel(%arg0: i32, %arg1: i32, %arg2: memref<16x32xbf16, #tpu.memory_space<vmem>>, %arg3: memref<32x64xbf16, #tpu.memory_space<vmem>>, %arg4: memref<1x64xf32, #tpu.memory_space<vmem>>, %arg5: memref<64x32xbf16, #tpu.memory_space<vmem>>, %arg6: memref<1x32xf32, #tpu.memory_space<vmem>>, %arg7: memref<1x32xf32, #tpu.memory_space<vmem>>, %arg8: memref<1x32xf32, #tpu.memory_space<vmem>>, %arg9: memref<16x32xbf16, #tpu.memory_space<vmem>>, %arg10: memref<16x32xf32, #tpu.memory_space<vmem>>) attributes {dimension_semantics = [#tpu.dimension_semantics<parallel>, #tpu.dimension_semantics<arbitrary>], iteration_bounds = array<i64: 1, 1>, scalar_prefetch = 0 : i64, scratch_operands = 1 : i64, tpu.core_type = #tpu.core_type<tc>, window_params = [{transform_indices = @transform_0, window_bounds = array<i64: 16, 32>}, {transform_indices = @transform_1, window_bounds = array<i64: 32, 64>}, {transform_indices = @transform_2, window_bounds = array<i64: 1, 64>}, {transform_indices = @transform_3, window_bounds = array<i64: 64, 32>}, {pipeline_mode = #tpu.pipeline_mode<synchronous>, transform_indices = @transform_4, window_bounds = array<i64: 1, 32>}, {pipeline_mode = #tpu.pipeline_mode<synchronous>, transform_indices = @transform_5, window_bounds = array<i64: 1, 32>}, {pipeline_mode = #tpu.pipeline_mode<synchronous>, transform_indices = @transform_6, window_bounds = array<i64: 1, 32>}, {transform_indices = @transform_7, window_bounds = array<i64: 16, 32>}]} {
    %c0_i32 = arith.constant 0 : i32
    %0 = arith.cmpi eq, %arg1, %c0_i32 : i32
    %1 = arith.extui %0 : i1 to i32
    %c0_i32_0 = arith.constant 0 : i32
    %2 = arith.cmpi ne, %1, %c0_i32_0 : i32
    scf.if %2 {
      %cst_16 = arith.constant 0.000000e+00 : f32
      %20 = vector.broadcast %cst_16 : f32 to vector<16x32xf32>
      %c0_17 = arith.constant 0 : index
      %c0_18 = arith.constant 0 : index
      %21 = vector.load %arg10[%c0_17, %c0_18] : memref<16x32xf32, #tpu.memory_space<vmem>>, vector<16x32xf32>
      tpu.vector_store %arg10[%c0_17, %c0_18], %20 {strides = array<i32>} : memref<16x32xf32, #tpu.memory_space<vmem>>, vector<16x32xf32>,
    } else {
    }
    %c0 = arith.constant 0 : index
    %c0_1 = arith.constant 0 : index
    %3 = vector.load %arg2[%c0, %c0_1] : memref<16x32xbf16, #tpu.memory_space<vmem>>, vector<16x32xbf16>
    %c0_2 = arith.constant 0 : index
    %c0_3 = arith.constant 0 : index
    %4 = vector.load %arg3[%c0_2, %c0_3] : memref<32x64xbf16, #tpu.memory_space<vmem>>, vector<32x64xbf16>
    %cst = arith.constant dense<0.000000e+00> : vector<16x64xf32>
    %5 = tpu.matmul %3, %4, %cst {dimension_numbers = #tpu.dot_dimension_numbers<[1], [0], [0], [1], [0, 0, 1, 1], [], []>} : vector<16x32xbf16>, vector<32x64xbf16>, vector<16x64xf32> -> vector<16x64xf32>
    %c0_4 = arith.constant 0 : index
    %c0_5 = arith.constant 0 : index
    %6 = vector.load %arg4[%c0_4, %c0_5] : memref<1x64xf32, #tpu.memory_space<vmem>>, vector<1x64xf32>
    %7 = vector.broadcast %6 : vector<1x64xf32> to vector<16x64xf32>
    %8 = arith.addf %5, %7 : vector<16x64xf32>
    %cst_6 = arith.constant 0.000000e+00 : f32
    %9 = vector.broadcast %cst_6 : f32 to vector<16x64xf32>
    %10 = arith.maximumf %8, %9 : vector<16x64xf32>
    %c0_7 = arith.constant 0 : index
    %c0_8 = arith.constant 0 : index
    %11 = vector.load %arg10[%c0_7, %c0_8] : memref<16x32xf32, #tpu.memory_space<vmem>>, vector<16x32xf32>
    %12 = arith.truncf %10 : vector<16x64xf32> to vector<16x64xbf16>
    %c0_9 = arith.constant 0 : index
    %c0_10 = arith.constant 0 : index
    %13 = vector.load %arg5[%c0_9, %c0_10] : memref<64x32xbf16, #tpu.memory_space<vmem>>, vector<64x32xbf16>
    %cst_11 = arith.constant dense<0.000000e+00> : vector<16x32xf32>
    %14 = tpu.matmul %12, %13, %cst_11 {dimension_numbers = #tpu.dot_dimension_numbers<[1], [0], [0], [1], [0, 0, 1, 1], [], []>} : vector<16x64xbf16>, vector<64x32xbf16>, vector<16x32xf32> -> vector<16x32xf32>
    %15 = arith.addf %11, %14 : vector<16x32xf32>
    %c0_12 = arith.constant 0 : index
    %c0_13 = arith.constant 0 : index
    %16 = vector.load %arg10[%c0_12, %c0_13] : memref<16x32xf32, #tpu.memory_space<vmem>>, vector<16x32xf32>
    tpu.vector_store %arg10[%c0_12, %c0_13], %15 {strides = array<i32>} : memref<16x32xf32, #tpu.memory_space<vmem>>, vector<16x32xf32>,
    %c0_i32_14 = arith.constant 0 : i32
    %17 = arith.cmpi eq, %arg1, %c0_i32_14 : i32
    %18 = arith.extui %17 : i1 to i32
    %c0_i32_15 = arith.constant 0 : i32
    %19 = arith.cmpi ne, %18, %c0_i32_15 : i32
    scf.if %19 {
      %c0_16 = arith.constant 0 : index
      %c0_17 = arith.constant 0 : index
      %20 = vector.load %arg10[%c0_16, %c0_17] : memref<16x32xf32, #tpu.memory_space<vmem>>, vector<16x32xf32>
      %c0_18 = arith.constant 0 : index
      %c0_19 = arith.constant 0 : index
      %21 = vector.load %arg6[%c0_18, %c0_19] : memref<1x32xf32, #tpu.memory_space<vmem>>, vector<1x32xf32>
      %22 = vector.broadcast %21 : vector<1x32xf32> to vector<16x32xf32>
      %23 = arith.addf %20, %22 : vector<16x32xf32>
      %c0_20 = arith.constant 0 : index
      %c0_21 = arith.constant 0 : index
      %24 = vector.load %arg2[%c0_20, %c0_21] : memref<16x32xbf16, #tpu.memory_space<vmem>>, vector<16x32xbf16>
      %25 = arith.extf %24 : vector<16x32xbf16> to vector<16x32xf32>
      %26 = arith.addf %23, %25 : vector<16x32xf32>
      %cst_22 = arith.constant dense<0.000000e+00> : vector<16xf32>
      %27 = vector.multi_reduction <add>, %26, %cst_22 [1] : vector<16x32xf32> to vector<16xf32>
      %28 = vector.shape_cast %27 : vector<16xf32> to vector<16x1xf32>
      %cst_23 = arith.constant 3.200000e+01 : f32
      %29 = vector.broadcast %cst_23 : f32 to vector<16x1xf32>
      %30 = arith.divf %28, %29 : vector<16x1xf32>
      %31 = vector.broadcast %30 : vector<16x1xf32> to vector<16x32xf32>
      %32 = arith.subf %26, %31 : vector<16x32xf32>
      %33 = arith.mulf %32, %32 : vector<16x32xf32>
      %cst_24 = arith.constant dense<0.000000e+00> : vector<16xf32>
      %34 = vector.multi_reduction <add>, %33, %cst_24 [1] : vector<16x32xf32> to vector<16xf32>
      %35 = vector.shape_cast %34 : vector<16xf32> to vector<16x1xf32>
      %cst_25 = arith.constant 3.200000e+01 : f32
      %36 = vector.broadcast %cst_25 : f32 to vector<16x1xf32>
      %37 = arith.divf %35, %36 : vector<16x1xf32>
      %cst_26 = arith.constant 9.99999974E-6 : f32
      %38 = vector.broadcast %cst_26 : f32 to vector<16x1xf32>
      %39 = arith.addf %37, %38 : vector<16x1xf32>
      %40 = math.rsqrt %39 : vector<16x1xf32>
      %41 = vector.broadcast %40 : vector<16x1xf32> to vector<16x32xf32>
      %42 = arith.mulf %32, %41 : vector<16x32xf32>
      %c0_27 = arith.constant 0 : index
      %c0_28 = arith.constant 0 : index
      %43 = vector.load %arg7[%c0_27, %c0_28] : memref<1x32xf32, #tpu.memory_space<vmem>>, vector<1x32xf32>
      %44 = vector.broadcast %43 : vector<1x32xf32> to vector<16x32xf32>
      %45 = arith.mulf %42, %44 : vector<16x32xf32>
      %c0_29 = arith.constant 0 : index
      %c0_30 = arith.constant 0 : index
      %46 = vector.load %arg8[%c0_29, %c0_30] : memref<1x32xf32, #tpu.memory_space<vmem>>, vector<1x32xf32>
      %47 = vector.broadcast %46 : vector<1x32xf32> to vector<16x32xf32>
      %48 = arith.addf %45, %47 : vector<16x32xf32>
      %49 = arith.truncf %48 : vector<16x32xf32> to vector<16x32xbf16>
      %c0_31 = arith.constant 0 : index
      %c0_32 = arith.constant 0 : index
      %50 = vector.load %arg9[%c0_31, %c0_32] : memref<16x32xbf16, #tpu.memory_space<vmem>>, vector<16x32xbf16>
      tpu.vector_store %arg9[%c0_31, %c0_32], %49 {strides = array<i32>} : memref<16x32xbf16, #tpu.memory_space<vmem>>, vector<16x32xbf16>,
    } else {
    }
    return
  }
  func.func @transform_0(%arg0: i32, %arg1: i32) -> (i32, i32) {
    %c0_i32 = arith.constant 0 : i32
    %c0_i32_0 = arith.constant 0 : i32
    return %arg0, %c0_i32 : i32, i32
  }
  func.func @transform_1(%arg0: i32, %arg1: i32) -> (i32, i32) {
    %c0_i32 = arith.constant 0 : i32
    %c0_i32_0 = arith.constant 0 : i32
    return %c0_i32, %arg1 : i32, i32
  }
  func.func @transform_2(%arg0: i32, %arg1: i32) -> (i32, i32) {
    %c0_i32 = arith.constant 0 : i32
    %c0_i32_0 = arith.constant 0 : i32
    return %c0_i32, %arg1 : i32, i32
  }
  func.func @transform_3(%arg0: i32, %arg1: i32) -> (i32, i32) {
    %c0_i32 = arith.constant 0 : i32
    %c0_i32_0 = arith.constant 0 : i32
    return %arg1, %c0_i32 : i32, i32
  }
  func.func @transform_4(%arg0: i32, %arg1: i32) -> (i32, i32) {
    %c0_i32 = arith.constant 0 : i32
    %c0_i32_0 = arith.constant 0 : i32
    %c0_i32_1 = arith.constant 0 : i32
    return %c0_i32, %c0_i32_0 : i32, i32
  }
  func.func @transform_5(%arg0: i32, %arg1: i32) -> (i32, i32) {
    %c0_i32 = arith.constant 0 : i32
    %c0_i32_0 = arith.constant 0 : i32
    %c0_i32_1 = arith.constant 0 : i32
    return %c0_i32, %c0_i32_0 : i32, i32
  }
  func.func @transform_6(%arg0: i32, %arg1: i32) -> (i32, i32) {
    %c0_i32 = arith.constant 0 : i32
    %c0_i32_0 = arith.constant 0 : i32
    %c0_i32_1 = arith.constant 0 : i32
    return %c0_i32, %c0_i32_0 : i32, i32
  }
  func.func @transform_7(%arg0: i32, %arg1: i32) -> (i32, i32) {
    %c0_i32 = arith.constant 0 : i32
    %c0_i32_0 = arith.constant 0 : i32
    return %arg0, %c0_i32 : i32, i32
  }
}

module attributes {stable_mosaic.version = 11 : i64} {
  func.func @_ffn_add_ln_kernel(%arg0: i32, %arg1: i32, %arg2: memref<16x32xbf16, #tpu.memory_space<vmem>>, %arg3: memref<32x64xbf16, #tpu.memory_space<vmem>>, %arg4: memref<1x64xf32, #tpu.memory_space<vmem>>, %arg5: memref<64x32xbf16, #tpu.memory_space<vmem>>, %arg6: memref<1x32xf32, #tpu.memory_space<vmem>>, %arg7: memref<1x32xf32, #tpu.memory_space<vmem>>, %arg8: memref<1x32xf32, #tpu.memory_space<vmem>>, %arg9: memref<16x32xf32, #tpu.memory_space<vmem>>, %arg10: memref<16x32xf32, #tpu.memory_space<vmem>>) attributes {dimension_semantics = [#tpu.dimension_semantics<parallel>, #tpu.dimension_semantics<arbitrary>], iteration_bounds = array<i64: 1, 1>, scalar_prefetch = 0 : i64, scratch_operands = 1 : i64, tpu.core_type = #tpu.core_type<tc>, window_params = [{transform_indices = @transform_0, window_bounds = array<i64: 16, 32>}, {transform_indices = @transform_1, window_bounds = array<i64: 32, 64>}, {transform_indices = @transform_2, window_bounds = array<i64: 1, 64>}, {transform_indices = @transform_3, window_bounds = array<i64: 64, 32>}, {pipeline_mode = #tpu.pipeline_mode<synchronous>, transform_indices = @transform_4, window_bounds = array<i64: 1, 32>}, {pipeline_mode = #tpu.pipeline_mode<synchronous>, transform_indices = @transform_5, window_bounds = array<i64: 1, 32>}, {pipeline_mode = #tpu.pipeline_mode<synchronous>, transform_indices = @transform_6, window_bounds = array<i64: 1, 32>}, {transform_indices = @transform_7, window_bounds = array<i64: 16, 32>}]} {
    %c0_i32 = arith.constant 0 : i32
    %0 = arith.cmpi eq, %arg1, %c0_i32 : i32
    %1 = arith.extui %0 : i1 to i32
    %c0_i32_0 = arith.constant 0 : i32
    %2 = arith.cmpi ne, %1, %c0_i32_0 : i32
    scf.if %2 {
      %cst_16 = arith.constant 0.000000e+00 : f32
      %20 = vector.broadcast %cst_16 : f32 to vector<16x32xf32>
      %c0_17 = arith.constant 0 : index
      %c0_18 = arith.constant 0 : index
      %21 = vector.load %arg10[%c0_17, %c0_18] : memref<16x32xf32, #tpu.memory_space<vmem>>, vector<16x32xf32>
      tpu.vector_store %arg10[%c0_17, %c0_18], %20 {strides = array<i32>} : memref<16x32xf32, #tpu.memory_space<vmem>>, vector<16x32xf32>,
    } else {
    }
    %c0 = arith.constant 0 : index
    %c0_1 = arith.constant 0 : index
    %3 = vector.load %arg2[%c0, %c0_1] : memref<16x32xbf16, #tpu.memory_space<vmem>>, vector<16x32xbf16>
    %c0_2 = arith.constant 0 : index
    %c0_3 = arith.constant 0 : index
    %4 = vector.load %arg3[%c0_2, %c0_3] : memref<32x64xbf16, #tpu.memory_space<vmem>>, vector<32x64xbf16>
    %cst = arith.constant dense<0.000000e+00> : vector<16x64xf32>
    %5 = tpu.matmul %3, %4, %cst {dimension_numbers = #tpu.dot_dimension_numbers<[1], [0], [0], [1], [0, 0, 1, 1], [], []>} : vector<16x32xbf16>, vector<32x64xbf16>, vector<16x64xf32> -> vector<16x64xf32>
    %c0_4 = arith.constant 0 : index
    %c0_5 = arith.constant 0 : index
    %6 = vector.load %arg4[%c0_4, %c0_5] : memref<1x64xf32, #tpu.memory_space<vmem>>, vector<1x64xf32>
    %7 = vector.broadcast %6 : vector<1x64xf32> to vector<16x64xf32>
    %8 = arith.addf %5, %7 : vector<16x64xf32>
    %cst_6 = arith.constant 0.000000e+00 : f32
    %9 = vector.broadcast %cst_6 : f32 to vector<16x64xf32>
    %10 = arith.maximumf %8, %9 : vector<16x64xf32>
    %c0_7 = arith.constant 0 : index
    %c0_8 = arith.constant 0 : index
    %11 = vector.load %arg10[%c0_7, %c0_8] : memref<16x32xf32, #tpu.memory_space<vmem>>, vector<16x32xf32>
    %12 = arith.truncf %10 : vector<16x64xf32> to vector<16x64xbf16>
    %c0_9 = arith.constant 0 : index
    %c0_10 = arith.constant 0 : index
    %13 = vector.load %arg5[%c0_9, %c0_10] : memref<64x32xbf16, #tpu.memory_space<vmem>>, vector<64x32xbf16>
    %cst_11 = arith.constant dense<0.000000e+00> : vector<16x32xf32>
    %14 = tpu.matmul %12, %13, %cst_11 {dimension_numbers = #tpu.dot_dimension_numbers<[1], [0], [0], [1], [0, 0, 1, 1], [], []>} : vector<16x64xbf16>, vector<64x32xbf16>, vector<16x32xf32> -> vector<16x32xf32>
    %15 = arith.addf %11, %14 : vector<16x32xf32>
    %c0_12 = arith.constant 0 : index
    %c0_13 = arith.constant 0 : index
    %16 = vector.load %arg10[%c0_12, %c0_13] : memref<16x32xf32, #tpu.memory_space<vmem>>, vector<16x32xf32>
    tpu.vector_store %arg10[%c0_12, %c0_13], %15 {strides = array<i32>} : memref<16x32xf32, #tpu.memory_space<vmem>>, vector<16x32xf32>,
    %c0_i32_14 = arith.constant 0 : i32
    %17 = arith.cmpi eq, %arg1, %c0_i32_14 : i32
    %18 = arith.extui %17 : i1 to i32
    %c0_i32_15 = arith.constant 0 : i32
    %19 = arith.cmpi ne, %18, %c0_i32_15 : i32
    scf.if %19 {
      %c0_16 = arith.constant 0 : index
      %c0_17 = arith.constant 0 : index
      %20 = vector.load %arg10[%c0_16, %c0_17] : memref<16x32xf32, #tpu.memory_space<vmem>>, vector<16x32xf32>
      %c0_18 = arith.constant 0 : index
      %c0_19 = arith.constant 0 : index
      %21 = vector.load %arg6[%c0_18, %c0_19] : memref<1x32xf32, #tpu.memory_space<vmem>>, vector<1x32xf32>
      %22 = vector.broadcast %21 : vector<1x32xf32> to vector<16x32xf32>
      %23 = arith.addf %20, %22 : vector<16x32xf32>
      %c0_20 = arith.constant 0 : index
      %c0_21 = arith.constant 0 : index
      %24 = vector.load %arg2[%c0_20, %c0_21] : memref<16x32xbf16, #tpu.memory_space<vmem>>, vector<16x32xbf16>
      %25 = arith.extf %24 : vector<16x32xbf16> to vector<16x32xf32>
      %26 = arith.addf %23, %25 : vector<16x32xf32>
      %cst_22 = arith.constant dense<0.000000e+00> : vector<16xf32>
      %27 = vector.multi_reduction <add>, %26, %cst_22 [1] : vector<16x32xf32> to vector<16xf32>
      %28 = vector.shape_cast %27 : vector<16xf32> to vector<16x1xf32>
      %cst_23 = arith.constant 3.200000e+01 : f32
      %29 = vector.broadcast %cst_23 : f32 to vector<16x1xf32>
      %30 = arith.divf %28, %29 : vector<16x1xf32>
      %31 = vector.broadcast %30 : vector<16x1xf32> to vector<16x32xf32>
      %32 = arith.subf %26, %31 : vector<16x32xf32>
      %33 = arith.mulf %32, %32 : vector<16x32xf32>
      %cst_24 = arith.constant dense<0.000000e+00> : vector<16xf32>
      %34 = vector.multi_reduction <add>, %33, %cst_24 [1] : vector<16x32xf32> to vector<16xf32>
      %35 = vector.shape_cast %34 : vector<16xf32> to vector<16x1xf32>
      %cst_25 = arith.constant 3.200000e+01 : f32
      %36 = vector.broadcast %cst_25 : f32 to vector<16x1xf32>
      %37 = arith.divf %35, %36 : vector<16x1xf32>
      %cst_26 = arith.constant 9.99999974E-6 : f32
      %38 = vector.broadcast %cst_26 : f32 to vector<16x1xf32>
      %39 = arith.addf %37, %38 : vector<16x1xf32>
      %40 = math.rsqrt %39 : vector<16x1xf32>
      %41 = vector.broadcast %40 : vector<16x1xf32> to vector<16x32xf32>
      %42 = arith.mulf %32, %41 : vector<16x32xf32>
      %c0_27 = arith.constant 0 : index
      %c0_28 = arith.constant 0 : index
      %43 = vector.load %arg7[%c0_27, %c0_28] : memref<1x32xf32, #tpu.memory_space<vmem>>, vector<1x32xf32>
      %44 = vector.broadcast %43 : vector<1x32xf32> to vector<16x32xf32>
      %45 = arith.mulf %42, %44 : vector<16x32xf32>
      %c0_29 = arith.constant 0 : index
      %c0_30 = arith.constant 0 : index
      %46 = vector.load %arg8[%c0_29, %c0_30] : memref<1x32xf32, #tpu.memory_space<vmem>>, vector<1x32xf32>
      %47 = vector.broadcast %46 : vector<1x32xf32> to vector<16x32xf32>
      %48 = arith.addf %45, %47 : vector<16x32xf32>
      %c0_31 = arith.constant 0 : index
      %c0_32 = arith.constant 0 : index
      %49 = vector.load %arg9[%c0_31, %c0_32] : memref<16x32xf32, #tpu.memory_space<vmem>>, vector<16x32xf32>
      tpu.vector_store %arg9[%c0_31, %c0_32], %48 {strides = array<i32>} : memref<16x32xf32, #tpu.memory_space<vmem>>, vector<16x32xf32>,
    } else {
    }
    return
  }
  func.func @transform_0(%arg0: i32, %arg1: i32) -> (i32, i32) {
    %c0_i32 = arith.constant 0 : i32
    %c0_i32_0 = arith.constant 0 : i32
    return %arg0, %c0_i32 : i32, i32
  }
  func.func @transform_1(%arg0: i32, %arg1: i32) -> (i32, i32) {
    %c0_i32 = arith.constant 0 : i32
    %c0_i32_0 = arith.constant 0 : i32
    return %c0_i32, %arg1 : i32, i32
  }
  func.func @transform_2(%arg0: i32, %arg1: i32) -> (i32, i32) {
    %c0_i32 = arith.constant 0 : i32
    %c0_i32_0 = arith.constant 0 : i32
    return %c0_i32, %arg1 : i32, i32
  }
  func.func @transform_3(%arg0: i32, %arg1: i32) -> (i32, i32) {
    %c0_i32 = arith.constant 0 : i32
    %c0_i32_0 = arith.constant 0 : i32
    return %arg1, %c0_i32 : i32, i32
  }
  func.func @transform_4(%arg0: i32, %arg1: i32) -> (i32, i32) {
    %c0_i32 = arith.constant 0 : i32
    %c0_i32_0 = arith.constant 0 : i32
    %c0_i32_1 = arith.constant 0 : i32
    return %c0_i32, %c0_i32_0 : i32, i32
  }
  func.func @transform_5(%arg0: i32, %arg1: i32) -> (i32, i32) {
    %c0_i32 = arith.constant 0 : i32
    %c0_i32_0 = arith.constant 0 : i32
    %c0_i32_1 = arith.constant 0 : i32
    return %c0_i32, %c0_i32_0 : i32, i32
  }
  func.func @transform_6(%arg0: i32, %arg1: i32) -> (i32, i32) {
    %c0_i32 = arith.constant 0 : i32
    %c0_i32_0 = arith.constant 0 : i32
    %c0_i32_1 = arith.constant 0 : i32
    return %c0_i32, %c0_i32_0 : i32, i32
  }
  func.func @transform_7(%arg0: i32, %arg1: i32) -> (i32, i32) {
    %c0_i32 = arith.constant 0 : i32
    %c0_i32_0 = arith.constant 0 : i32
    return %arg0, %c0_i32 : i32, i32
  }
}

</mosaic_0001>

<bundles_post_ra>
// kernel: custom_transformer_encoder_moe.8
= control target key start
LH: loop header
LB: loop body
LE: loop exit
PB: predicated region body
PF: predicated region fallthrough
CT: control target
= control target key end

     0   :  { %vm19_vm0 = vcmask 785408   ;;  %v151_v0 = vmov 0.0   ;;  %vm152_vm1 = vmmov 0   ;;  %vm47_vm2 = vcmask 261120   ;;  %s195_s1 = inlined_call_operand.vmem [shape: bf16[32,96], index: 1, kind: input, shape index: {}]   ;;  %s196_s0 = inlined_call_operand.vmem [shape: bf16[16,32], index: 0, kind: input, shape index: {}]   ;;  %s197_s2 = inlined_call_operand.vmem [shape: f32[1,96], index: 2, kind: input, shape index: {}]   ;;  %s198_s3 = inlined_call_operand.vmem [shape: bf16[16,96], index: 3, kind: output, shape index: {}]  }
   0x1   :  { %138 = vmatprep.subr.bf16.mxu0 %v151_v0  ;;  %v148_v1 = vld [vmem:[%s195_s1] sm:$0xff]   ;;  %142 = vmatprep.mubr.msk.bf16.mxu0 %vm152_vm1, %v151_v0  ;;  %20 = vst.msk [vmem:[#allocation2] sm:$0xff] %vm19_vm0, %v151_v0  ;;  %21 = vst.msk [vmem:[#allocation2 + $0x8] sm:$0xff] %vm19_vm0, %v151_v0  ;;  %v149_v2 = vld [vmem:[%s195_s1 + $0x8] sm:$0xff]   ;;  %vm119_vm3 = vcmask 781312  }
   0x2   :  { %139 = vmatpush3.bf16.msra.mxu0 %v148_v1  ;;  %v150_v3 = vld [vmem:[%s196_s0] sm:$0xff]  }
   0x3   :  { %140 = vmatprep.subr.bf16.mxu0 %v151_v0  ;;  %v130_v12 = vld [vmem:[%s197_s2] ss:$0 sm:$0xff] }
   0x6   :  { %141 = vmatpush3.bf16.msra.mxu0 %v149_v2 }
   0x8   :  { %v22_v4 = vld [vmem:[#allocation2] sm:$0xff]  ;;  %v23_v6 = vld [vmem:[#allocation2 + $0x8] sm:$0xff] }
   0x9   :  { %143 = vmatmul.mubr.msk.bf16.vlgmr.msra.gmra.mrb[0].mxu0 %vm47_vm2, %v150_v3 }
  0xdc   :  { %v85_v5 = vpop.f32.mrb[0].mxu0 }
  0xdd   :  { %v92_v7 = vadd.f32 %v85_v5, %v22_v4  ;;  %v144_v8 = vpop.f32.mrb[1].mxu0 }
  0xde   :  { %v88_v9 = vpop.f32.mrb[2].mxu0 }
  0xdf   :  { %95 = vst.msk [vmem:[#allocation2] sm:$0xff] %vm19_vm0, %v92_v7  ;;  %v93_v10 = vadd.f32 %v88_v9, %v23_v6  ;;  %v145_v11 = vpop.f32.mrb[3].mxu0 }
  0xe1   :  { %96 = vst.msk [vmem:[#allocation2 + $0x8] sm:$0xff] %vm19_vm0, %v93_v10 }
  0xe6   :  { %v100_v13 = vld [vmem:[#allocation2] sm:$0xff] }
  0xe7   :  { %v109_v14 = vadd.f32 %v130_v12, %v100_v13 }
  0xe8   :  { %v101_v15 = vld [vmem:[#allocation2 + $0x8] sm:$0xff] }
  0xe9   :  { %v133_v16 = vpack.c.bf16 %v109_v14, %v109_v14  ;;  %v110_v17 = vadd.f32 %v130_v12, %v101_v15 }
  0xeb   :  { %120 = vst.msk [vmem:[%s198_s3] sm:$0xf] %vm119_vm3, %v133_v16  ;;  %v134_v18 = vpack.c.bf16 %v110_v17, %v110_v17 }
  0xed   :  { %121 = vst.msk [vmem:[%s198_s3 + $0x4] sm:$0xf] %vm119_vm3, %v134_v18 }

// kernel: custom_transformer_encoder_moe.9
= control target key start
LH: loop header
LB: loop body
LE: loop exit
PB: predicated region body
PF: predicated region fallthrough
CT: control target
= control target key end

     0   :  { %s821_s6 = smov 0   ;;  %s920_s0 = inlined_call_operand.vmem [shape: bf16[2,8,96], index: 0, kind: input, shape index: {}]   ;;  %s921_s1 = inlined_call_operand.vmem [shape: bf16[2,8,32], index: 1, kind: output, shape index: {}]  }
   0x1 LB: > { %s652_s7 = sadd.s32 4294967295, %s793_s6   ;;  %p656_p0 = scmp.ge.s32.totalorder %s793_s6, 1  ;;  %s793_s6 = sphi %s821_s6, %s11_s6  }
   0x2   : > { %p86_p1 = scmp.lt.s32.totalorder %s793_s6, 3 }
   0x4   : > { %p87_p2 = pnand %p656_p0, %p86_p1 }
   0x5   : > { %p104_p3 = scmp.lt.s32.totalorder (!%p87_p2), %s652_s7, 1  ;;  %v795_v0 = vmov (!%p87_p2), 0.0   ;;  %vm796_vm0 = vmmov (!%p87_p2), 0   ;;  %s797_s12 = smov (!%p87_p2), 96   ;;  %vm119_vm1 = vcmask (!%p87_p2), 64512   ;;  %vm183_vm2 = vcmask (!%p87_p2), 1043456  }
   0x6   : > { %90 = sbr.rel (%p87_p2) target bundleno = 1597 (0x63d), region = 24  ;;  %695 = vmatprep.subr.bf16.mxu0 (!%p87_p2), %v795_v0  ;;  %697 = vmatprep.mubr.msk.bf16.mxu0 (!%p87_p2), %vm796_vm0, %v795_v0  ;;  %s798_s13 = smov (!%p87_p2), 64   ;;  %vm228_vm3 = vcmask (!%p87_p2), 60416   ;;  %vm351_vm4 = vcmask (!%p87_p2), 126016   ;;  %vm474_vm5 = vcmask (!%p87_p2), 191616   ;;  %vm597_vm6 = vcmask (!%p87_p2), 257216  }
   0x7   : > { %701 = vmatprep.subr.bf16.mxu1 (!%p87_p2), %v795_v0  ;;  %703 = vmatprep.mubr.msk.bf16.mxu1 (!%p87_p2), %vm796_vm0, %v795_v0  ;;  %s799_s14 = smov (!%p87_p2), 88   ;;  %s800_s15 = smov (!%p87_p2), 72  }
   0x8   : > { %s801_s16 = smov (!%p87_p2), 120   ;;  %s802_s17 = smov (!%p87_p2), 80  }
   0x9   : > { %s803_s18 = smov (!%p87_p2), 112   ;;  %s804_s19 = smov (!%p87_p2), 104  }
   0xa   : > { %s805_s23 = smov (!%p87_p2), 56   ;;  %s806_s24 = smov (!%p87_p2), 48  }
   0xb   : > { %s807_s25 = smov (!%p87_p2), 40   ;;  %s808_s26 = smov (!%p87_p2), 8  }
   0xc   : > { %s809_s27 = smov (!%p87_p2), 16   ;;  %s810_s28 = smov (!%p87_p2), 24  }
   0xd   : > { %s923_s7 = smov (!%p104_p3, %s652_s7), 1 }
   0xe   : > { %s657_s8 = sshll.u32 %s923_s7, 2 }
   0xf   : > { %s843_s11 = scalar_lea.vmem %s920_s0, %s657_s8  ;;  %s890_s22 = scalar_lea.vmem %s921_s1, %s657_s8 }
  0x10   : > { %v113_v1 = vld [vmem:[%s843_s11] sm:$0xf] }
  0x11   : > { %v659_v2 = vcombine.low %v113_v1, %v113_v1  ;;  %v852_v5 = vld [vmem:[%s843_s11] ss:$0 sps:$4 sm:$0xff]  }
  0x12   : > { %v857_v11 = vld [vmem:[%s843_s11] ss:$0 sps:$4 sm:$0xff]  }
  0x13   : > { %117 = vrot.lane.b32.xlu0 %v659_v2, %s797_s12  ;;  %178 = vrot.lane.b32.xlu1 %v659_v2, %s798_s13  ;;  %v865_v19 = vld [vmem:[%s843_s11] ss:$0 sps:$4 sm:$0xff]  }
  0x17   : > { %236 = vrot.lane.b32.xlu1 %v852_v5, %s799_s14 }
  0x85   : > { %v118_v3 = vpop.permute.xlu0 %117  ;;  %v179_v12 = vpop.permute.xlu1 %178 }
  0x86   : > { %v124_v4 = vsel %vm119_vm1, %v118_v3, 0  ;;  %v185_v13 = vsel %vm183_vm2, %v179_v12, 0 }
  0x87   : > { %696 = vmatpush3.bf16.xpose.msra.mxu0 %v124_v4  ;;  %702 = vmatpush3.bf16.msra.mxu1 %v185_v13 }
  0x88   : > { %713 = vmatprep.subr.bf16.mxu0 %v795_v0  ;;  %707 = vmatprep.subr.bf16.mxu1 %v795_v0 }
  0x89   : > { %v237_v20 = vpop.permute.xlu1 %236 }
  0x8a   : > { %v242_v26 = vsel %vm119_vm1, %v237_v20, 0 }
  0x8e   : > { %698 = vmatmul.mubr.msk.bf16.vlgmr.msra.gmra.mrb[0].mxu0 %vm119_vm1, %v113_v1 }
  0x8f   : > { %715 = vmatprep.mubr.msk.bf16.mxu0 %vm796_vm0, %v795_v0 }
 0x161   : > { %v160_v6 = vpop.f32.mrb[0].mxu0 }
 0x162   : > { %v699_v7 = vpop.f32.mrb[1].mxu0  ;;  %v166_v8 = vsel %vm119_vm1, %v160_v6, -inf }
 0x163   : > { %167 = vmax.xlane.f32.xlu0 %v166_v8  ;;  %v163_v9 = vpop.f32.mrb[2].mxu0 }
 0x164   : > { %v700_v10 = vpop.f32.mrb[3].mxu0 }
 0x179   : > { %482 = vrot.lane.b32.xlu0 %v857_v11, %s800_s15 }
 0x1f0   : > { %v168_v14 = vpop.xlane.xlu0 %167 }
 0x1f1   : > { %v169_v15 = vsub.f32 %v160_v6, %v168_v14 }
 0x1f3   : > { %v170_v16 = vmul.f32 1.442695, %v169_v15 }
 0x1f4   : > { %v483_v29 = vpop.permute.xlu0 %482 }
 0x1f5   : > { %771 = vpow2.f32 %v170_v16  ;;  %v488_v31 = vsel %vm119_vm1, %v483_v29, 0 }
 0x1ff   : > { %v772_v17 = vpop.eup %771 }
 0x200   : > { %v172_v18 = vsel %vm119_vm1, %v772_v17, 0.0 }
 0x201   : > { %173 = vadd.xlane.f32.xlu1 %v172_v18 }
 0x212   : > { %234 = vrot.lane.b32.xlu1 %v852_v5, %s801_s16 }
 0x216   : > { %359 = vrot.lane.b32.xlu1 %v865_v19, %s802_s17 }
 0x21a   : > { %357 = vrot.lane.b32.xlu1 %v865_v19, %s803_s18 }
 0x21e   : > { %480 = vrot.lane.b32.xlu1 %v857_v11, %s804_s19 }
 0x28e   : > { %v174_v21 = vpop.xlane.xlu1 %173 }
 0x28f   : > { %773 = vrcp.f32 %v174_v21 }
 0x292   : > { %v235_v24 = vpop.permute.xlu1 %234 }
 0x296   : > { %v360_v27 = vpop.permute.xlu1 %359 }
 0x297   : > { %v365_v28 = vsel %vm119_vm1, %v360_v27, 0 }
 0x299   : > { %v774_v22 = vpop.eup %773 }
 0x29a   : > { %v176_v23 = vmul.f32 %v774_v22, %v772_v17  ;;  %v358_v30 = vpop.permute.xlu1 %357 }
 0x29c   : > { %v177_v25 = vpack.c.bf16 %v176_v23, %v176_v23 }
 0x29e   : > { %704 = vmatmul.mubr.msk.bf16.vlgmr.msra.gmra.mrb[0].mxu1 %vm119_vm1, %v177_v25  ;;  %v481_v32 = vpop.permute.xlu1 %480 }
 0x29f   : > { %708 = vmatpush3.bf16.xpose.msra.mxu1 %v242_v26  ;;  %709 = vmatprep.mubr.msk.bf16.mxu1 %vm796_vm0, %v795_v0 }
 0x2a0   : > { %719 = vmatprep.subr.bf16.mxu1 %v795_v0 }
 0x2a6   : > { %710 = vmatmul.mubr.msk.bf16.vlgmr.msra.gmra.mrb[4].mxu1 %vm119_vm1, %v235_v24 }
 0x2a7   : > { %720 = vmatpush3.bf16.xpose.msra.mxu1 %v365_v28  ;;  %721 = vmatprep.mubr.msk.bf16.mxu1 %vm796_vm0, %v795_v0 }
 0x2a8   : > { %731 = vmatprep.subr.bf16.mxu1 %v795_v0 }
 0x2ae   : > { %722 = vmatmul.mubr.msk.bf16.vlgmr.msra.gmra.mrb[8].mxu1 %vm119_vm1, %v358_v30 }
 0x2af   : > { %732 = vmatpush3.bf16.xpose.msra.mxu1 %v488_v31  ;;  %733 = vmatprep.mubr.msk.bf16.mxu1 %vm796_vm0, %v795_v0 }
 0x2b6   : > { %734 = vmatmul.mubr.msk.bf16.vlgmr.msra.gmra.mrb[12].mxu1 %vm119_vm1, %v481_v32 }
 0x371   : > { %v221_v33 = vpop.f32.mrb[0].mxu1 }
 0x372   : > { %v227_v34 = vpack.c.bf16 %v221_v33, %v221_v33  ;;  %v705_v35 = vpop.f32.mrb[1].mxu1 }
 0x373   : > { %v224_v36 = vpop.f32.mrb[2].mxu1 }
 0x374   : > { %229 = vst.msk [vmem:[%s890_s22] sm:$0xf] %vm228_vm3, %v227_v34  ;;  %v706_v37 = vpop.f32.mrb[3].mxu1 }
 0x379   : > { %v278_v38 = vpop.f32.mrb[4].mxu1 }
 0x37a   : > { %v711_v39 = vpop.f32.mrb[5].mxu1  ;;  %v284_v40 = vsel %vm119_vm1, %v278_v38, -inf }
 0x37b   : > { %285 = vmax.xlane.f32.xlu1 %v284_v40  ;;  %v281_v41 = vpop.f32.mrb[6].mxu1 }
 0x37c   : > { %v712_v42 = vpop.f32.mrb[7].mxu1 }
 0x381   : > { %v401_v43 = vpop.f32.mrb[8].mxu1 }
 0x382   : > { %v407_v44 = vsel %vm119_vm1, %v401_v43, -inf  ;;  %v723_v45 = vpop.f32.mrb[9].mxu1 }
 0x383   : > { %408 = vmax.xlane.f32.xlu0 %v407_v44  ;;  %v404_v46 = vpop.f32.mrb[10].mxu1 }
 0x384   : > { %v724_v47 = vpop.f32.mrb[11].mxu1 }
 0x389   : > { %v524_v48 = vpop.f32.mrb[12].mxu1 }
 0x38a   : > { %v530_v49 = vsel %vm119_vm1, %v524_v48, -inf  ;;  %v735_v50 = vpop.f32.mrb[13].mxu1 }
 0x38b   : > { %531 = vmax.xlane.f32.xlu1 %v530_v49  ;;  %v527_v51 = vpop.f32.mrb[14].mxu1 }
 0x38c   : > { %v736_v52 = vpop.f32.mrb[15].mxu1 }
 0x408   : > { %v286_v53 = vpop.xlane.xlu1 %285 }
 0x409   : > { %v287_v54 = vsub.f32 %v278_v38, %v286_v53 }
 0x40b   : > { %v288_v55 = vmul.f32 1.442695, %v287_v54 }
 0x40d   : > { %775 = vpow2.f32 %v288_v55 }
 0x410   : > { %v409_v63 = vpop.xlane.xlu0 %408 }
 0x411   : > { %v410_v1 = vsub.f32 %v401_v43, %v409_v63 }
 0x413   : > { %v411_v2 = vmul.f32 1.442695, %v410_v1 }
 0x417   : > { %v776_v56 = vpop.eup %775 }
 0x418   : > { %v532_v57 = vpop.xlane.xlu1 %531  ;;  %v290_v58 = vsel %vm119_vm1, %v776_v56, 0.0 }
 0x419   : > { %v533_v59 = vsub.f32 %v524_v48, %v532_v57  ;;  %291 = vadd.xlane.f32.xlu1 %v290_v58 }
 0x41b   : > { %v534_v60 = vmul.f32 1.442695, %v533_v59 }
 0x41d   : > { %777 = vpow2.f32 %v534_v60 }
 0x41e   : > { %779 = vpow2.f32 %v411_v2 }
 0x427   : > { %v778_v61 = vpop.eup %777 }
 0x428   : > { %v536_v62 = vsel %vm119_vm1, %v778_v61, 0.0  ;;  %v780_v3 = vpop.eup %779 }
 0x429   : > { %537 = vadd.xlane.f32.xlu0 %v536_v62  ;;  %v413_v4 = vsel %vm119_vm1, %v780_v3, 0.0 }
 0x42a   : > { %296 = vrot.lane.b32.xlu1 %v852_v5, %s805_s23 }
 0x43f   : > { %419 = vrot.lane.b32.xlu0 %v865_v19, %s806_s24 }
 0x44e   : > { %414 = vadd.xlane.f32.xlu1 %v413_v4 }
 0x45f   : > { %542 = vrot.lane.b32.xlu1 %v857_v11, %s807_s25 }
 0x4a6   : > { %v292_v6 = vpop.xlane.xlu1 %291 }
 0x4a7   : > { %781 = vrcp.f32 %v292_v6 }
 0x4aa   : > { %v297_v7 = vpop.permute.xlu1 %296 }
 0x4ab   : > { %v302_v8 = vsel %vm183_vm2, %v297_v7, 0 }
 0x4ac   : > { %714 = vmatpush3.bf16.msra.mxu0 %v302_v8 }
 0x4ad   : > { %725 = vmatprep.subr.bf16.mxu0 %v795_v0 }
 0x4b1   : > { %v782_v5 = vpop.eup %781 }
 0x4b2   : > { %v294_v9 = vmul.f32 %v782_v5, %v776_v56 }
 0x4b4   : > { %v295_v10 = vpack.c.bf16 %v294_v9, %v294_v9 }
 0x4b6   : > { %716 = vmatmul.mubr.msk.bf16.vlgmr.msra.gmra.mrb[4].mxu0 %vm119_vm1, %v295_v10  ;;  %v538_v12 = vpop.xlane.xlu0 %537 }
 0x4b7   : > { %727 = vmatprep.mubr.msk.bf16.mxu0 %vm796_vm0, %v795_v0 }
 0x4ba   : > { %v420_v13 = vpop.permute.xlu0 %419 }
 0x4bb   : > { %v425_v11 = vsel %vm183_vm2, %v420_v13, 0 }
 0x4bc   : > { %726 = vmatpush3.bf16.msra.mxu0 %v425_v11 }
 0x4bd   : > { %737 = vmatprep.subr.bf16.mxu0 %v795_v0 }
 0x4db   : > { %v415_v14 = vpop.xlane.xlu1 %414 }
 0x4dc   : > { %783 = vrcp.f32 %v415_v14 }
 0x4dd   : > { %785 = vrcp.f32 %v538_v12 }
 0x4df   : > { %v543_v16 = vpop.permute.xlu1 %542 }
 0x4e0   : > { %v548_v18 = vsel %vm183_vm2, %v543_v16, 0 }
 0x4e6   : > { %v784_v15 = vpop.eup %783 }
 0x4e7   : > { %v417_v17 = vmul.f32 %v784_v15, %v780_v3  ;;  %v786_v20 = vpop.eup %785 }
 0x4e8   : > { %v540_v21 = vmul.f32 %v786_v20, %v778_v61 }
 0x4e9   : > { %v418_v19 = vpack.c.bf16 %v417_v17, %v417_v17 }
 0x4ea   : > { %v541_v22 = vpack.c.bf16 %v540_v21, %v540_v21 }
 0x4eb   : > { %728 = vmatmul.mubr.msk.bf16.vlgmr.msra.gmra.mrb[8].mxu0 %vm119_vm1, %v418_v19 }
 0x4ec   : > { %738 = vmatpush3.bf16.msra.mxu0 %v548_v18  ;;  %739 = vmatprep.mubr.msk.bf16.mxu0 %vm796_vm0, %v795_v0 }
 0x4f3   : > { %740 = vmatmul.mubr.msk.bf16.vlgmr.msra.gmra.mrb[12].mxu0 %vm119_vm1, %v541_v22 }
 0x589   : > { %v338_v23 = vpop.f32.mrb[4].mxu0 }
 0x58a   : > { %v676_v24 = vpack.c.bf16 %v338_v23, %v338_v23  ;;  %v717_v25 = vpop.f32.mrb[5].mxu0 }
 0x58b   : > { %v341_v26 = vpop.f32.mrb[6].mxu0 }
 0x58c   : > { %348 = vrot.lane.b32.xlu1 %v676_v24, %s808_s26  ;;  %v718_v27 = vpop.f32.mrb[7].mxu0 }
 0x5be   : > { %v461_v28 = vpop.f32.mrb[8].mxu0 }
 0x5bf   : > { %v677_v29 = vpack.c.bf16 %v461_v28, %v461_v28  ;;  %v729_v30 = vpop.f32.mrb[9].mxu0 }
 0x5c0   : > { %v464_v31 = vpop.f32.mrb[10].mxu0 }
 0x5c1   : > { %471 = vrot.lane.b32.xlu0 %v677_v29, %s809_s27  ;;  %v730_v0 = vpop.f32.mrb[11].mxu0 }
 0x5c6   : > { %v584_v32 = vpop.f32.mrb[12].mxu0 }
 0x5c7   : > { %v678_v33 = vpack.c.bf16 %v584_v32, %v584_v32  ;;  %v741_v34 = vpop.f32.mrb[13].mxu0 }
 0x5c8   : > { %v587_v35 = vpop.f32.mrb[14].mxu0 }
 0x5c9   : > { %594 = vrot.lane.b32.xlu1 %v678_v33, %s810_s28  ;;  %v742_v36 = vpop.f32.mrb[15].mxu0 }
 0x5fe   : > { %v349_v37 = vpop.permute.xlu1 %348 }
 0x5ff   : > { %352 = vst.msk [vmem:[%s890_s22] sm:$0xf] %vm351_vm4, %v349_v37 }
 0x633   : > { %v472_v38 = vpop.permute.xlu0 %471 }
 0x634   : > { %475 = vst.msk [vmem:[%s890_s22] sm:$0xf] %vm474_vm5, %v472_v38 }
 0x63b   : > { %v595_v39 = vpop.permute.xlu1 %594 }
 0x63c   : > { %598 = vst.msk [vmem:[%s890_s22] sm:$0xf] %vm597_vm6, %v595_v39 }
 0x63d PF: > { %s11_s6 = sadd.s32 1, %s793_s6  }
 0x63e   : > { %p8_p4 = scmp.ge.s32.totalorder %s11_s6, 4  }
 0x640   :  { %10 = sbr.rel (!%p8_p4) target bundleno = 1 (0x1), region = 54 }

// kernel: custom_transformer_encoder_moe.10
= control target key start
LH: loop header
LB: loop body
LE: loop exit
PB: predicated region body
PF: predicated region fallthrough
CT: control target
= control target key end

     0   :  { %vm28_vm0 = vcmask 261120   ;;  %v214_v0 = vmov 0.0   ;;  %vm215_vm1 = vmmov 0   ;;  %vm176_vm2 = vcmask 257024   ;;  %s290_s1 = inlined_call_operand.vmem [shape: bf16[32,32], index: 1, kind: input, shape index: {}]   ;;  %s291_s0 = inlined_call_operand.vmem [shape: bf16[16,32], index: 0, kind: input, shape index: {}]   ;;  %s292_s2 = inlined_call_operand.vmem [shape: f32[1,32], index: 2, kind: input, shape index: {}]   ;;  %s293_s3 = inlined_call_operand.vmem [shape: f32[16,32], index: 3, kind: input, shape index: {}]   ;;  %s294_s4 = inlined_call_operand.vmem [shape: f32[1,32], index: 4, kind: input, shape index: {}]   ;;  %s295_s5 = inlined_call_operand.vmem [shape: f32[1,32], index: 5, kind: input, shape index: {}]   ;;  %s296_s6 = inlined_call_operand.vmem [shape: bf16[16,32], index: 6, kind: output, shape index: {}]  }
   0x1   :  { %197 = vmatprep.subr.bf16.mxu0 %v214_v0  ;;  %v207_v1 = vld [vmem:[%s290_s1] sm:$0xff]   ;;  %201 = vmatprep.mubr.msk.bf16.mxu0 %vm215_vm1, %v214_v0  ;;  %29 = vst.msk [vmem:[#allocation2] sm:$0xff] %vm28_vm0, %v214_v0  ;;  %30 = vst.msk [vmem:[#allocation2 + $0x8] sm:$0xff] %vm28_vm0, %v214_v0  ;;  %v208_v2 = vld [vmem:[%s290_s1 + $0x8] sm:$0xff]  }
   0x2   :  { %198 = vmatpush3.bf16.msra.mxu0 %v207_v1  ;;  %v209_v3 = vld [vmem:[%s291_s0] sm:$0xff]   ;;  %v120_v17 = vld [vmem:[%s293_s3 + $0x8] sm:$0xff] }
   0x3   :  { %199 = vmatprep.subr.bf16.mxu0 %v214_v0  ;;  %v187_v12 = vld [vmem:[%s292_s2] ss:$0 sm:$0xff] }
   0x4   :  { %v119_v14 = vld [vmem:[%s293_s3] sm:$0xff] }
   0x5   :  { %v188_v40 = vld [vmem:[%s294_s4] ss:$0 sm:$0xff] }
   0x6   :  { %200 = vmatpush3.bf16.msra.mxu0 %v208_v2  ;;  %v189_v42 = vld [vmem:[%s295_s5] ss:$0 sm:$0xff] }
   0x8   :  { %v31_v4 = vld [vmem:[#allocation2] sm:$0xff]  ;;  %v32_v6 = vld [vmem:[#allocation2 + $0x8] sm:$0xff] }
   0x9   :  { %202 = vmatmul.mubr.msk.bf16.vlgmr.msra.gmra.mrb[0].mxu0 %vm28_vm0, %v209_v3 }
  0xdc   :  { %v94_v5 = vpop.f32.mrb[0].mxu0 }
  0xdd   :  { %v101_v7 = vadd.f32 %v94_v5, %v31_v4  ;;  %v203_v8 = vpop.f32.mrb[1].mxu0 }
  0xde   :  { %v97_v9 = vpop.f32.mrb[2].mxu0 }
  0xdf   :  { %103 = vst.msk [vmem:[#allocation2] sm:$0xff] %vm28_vm0, %v101_v7  ;;  %v102_v10 = vadd.f32 %v97_v9, %v32_v6  ;;  %v204_v11 = vpop.f32.mrb[3].mxu0 }
  0xe1   :  { %104 = vst.msk [vmem:[#allocation2 + $0x8] sm:$0xff] %vm28_vm0, %v102_v10 }
  0xe6   :  { %v108_v13 = vld [vmem:[#allocation2] sm:$0xff] }
  0xe7   :  { %v117_v15 = vadd.f32 %v187_v12, %v108_v13 }
  0xe8   :  { %v109_v16 = vld [vmem:[#allocation2 + $0x8] sm:$0xff] }
  0xe9   :  { %v121_v18 = vadd.f32 %v119_v14, %v117_v15  ;;  %v118_v19 = vadd.f32 %v187_v12, %v109_v16 }
  0xeb   :  { %v123_v20 = vsel %vm28_vm0, %v121_v18, 0.0  ;;  %v122_v21 = vadd.f32 %v120_v17, %v118_v19 }
  0xec   :  { %124 = vadd.xlane.f32.xlu0 %v123_v20 }
  0xed   :  { %v126_v22 = vsel %vm28_vm0, %v122_v21, 0.0 }
  0xf0   :  { %127 = vadd.xlane.f32.xlu0 %v126_v22 }
 0x179   :  { %v125_v23 = vpop.xlane.xlu0 %124 }
 0x17a   :  { %v130_v24 = vmul.f32 0.03125, %v125_v23 }
 0x17c   :  { %v132_v25 = vsub.f32 %v121_v18, %v130_v24 }
 0x17d   :  { %v128_v26 = vpop.xlane.xlu0 %127 }
 0x17e   :  { %v131_v27 = vmul.f32 0.03125, %v128_v26  ;;  %v134_v28 = vmul.f32 %v132_v25, %v132_v25 }
 0x180   :  { %v133_v29 = vsub.f32 %v122_v21, %v131_v27  ;;  %v136_v30 = vsel %vm28_vm0, %v134_v28, 0.0 }
 0x181   :  { %137 = vadd.xlane.f32.xlu1 %v136_v30 }
 0x182   :  { %v135_v31 = vmul.f32 %v133_v29, %v133_v29 }
 0x184   :  { %v139_v32 = vsel %vm28_vm0, %v135_v31, 0.0 }
 0x185   :  { %140 = vadd.xlane.f32.xlu1 %v139_v32 }
 0x20e   :  { %v138_v33 = vpop.xlane.xlu1 %137 }
 0x20f   :  { %v142_v34 = vmul.f32 0.03125, %v138_v33 }
 0x211   :  { %v144_v35 = vadd.f32 1e-05, %v142_v34 }
 0x212   :  { %v141_v36 = vpop.xlane.xlu1 %140 }
 0x213   :  { %210 = vrsqrt.f32 %v144_v35  ;;  %v143_v37 = vmul.f32 0.03125, %v141_v36 }
 0x215   :  { %v145_v38 = vadd.f32 1e-05, %v143_v37 }
 0x217   :  { %212 = vrsqrt.f32 %v145_v38 }
 0x21d   :  { %v211_v39 = vpop.eup %210 }
 0x21e   :  { %v148_v41 = vmul.f32 %v211_v39, %v132_v25 }
 0x220   :  { %v157_v43 = vmul.f32 %v188_v40, %v148_v41 }
 0x221   :  { %v213_v44 = vpop.eup %212 }
 0x222   :  { %v166_v45 = vadd.f32 %v189_v42, %v157_v43  ;;  %v149_v46 = vmul.f32 %v213_v44, %v133_v29 }
 0x224   :  { %v192_v47 = vpack.c.bf16 %v166_v45, %v166_v45  ;;  %v158_v48 = vmul.f32 %v188_v40, %v149_v46 }
 0x226   :  { %177 = vst.msk [vmem:[%s296_s6] sm:$0xf] %vm176_vm2, %v192_v47  ;;  %v167_v49 = vadd.f32 %v189_v42, %v158_v48 }
 0x228   :  { %v193_v50 = vpack.c.bf16 %v167_v49, %v167_v49 }
 0x22a   :  { %178 = vst.msk [vmem:[%s296_s6 + $0x4] sm:$0xf] %vm176_vm2, %v193_v50 }

// kernel: custom_transformer_encoder_moe.14
= control target key start
LH: loop header
LB: loop body
LE: loop exit
PB: predicated region body
PF: predicated region fallthrough
CT: control target
= control target key end

     0   :  { %vm28_vm0 = vcmask 261120   ;;  %v220_v0 = vmov 0.0   ;;  %vm221_vm1 = vmmov 0   ;;  %vm178_vm2 = vcmask 257024   ;;  %s293_s1 = inlined_call_operand.vmem [shape: bf16[32,32], index: 1, kind: input, shape index: {}]   ;;  %s294_s0 = inlined_call_operand.vmem [shape: bf16[16,32], index: 0, kind: input, shape index: {}]   ;;  %s295_s3 = inlined_call_operand.vmem [shape: bf16[16,32], index: 3, kind: input, shape index: {}]   ;;  %s296_s2 = inlined_call_operand.vmem [shape: f32[1,32], index: 2, kind: input, shape index: {}]   ;;  %s297_s4 = inlined_call_operand.vmem [shape: f32[1,32], index: 4, kind: input, shape index: {}]   ;;  %s298_s5 = inlined_call_operand.vmem [shape: f32[1,32], index: 5, kind: input, shape index: {}]   ;;  %s299_s6 = inlined_call_operand.vmem [shape: bf16[16,32], index: 6, kind: output, shape index: {}]  }
   0x1   :  { %203 = vmatprep.subr.bf16.mxu0 %v220_v0  ;;  %v213_v1 = vld [vmem:[%s293_s1] sm:$0xff]   ;;  %207 = vmatprep.mubr.msk.bf16.mxu0 %vm221_vm1, %v220_v0  ;;  %29 = vst.msk [vmem:[#allocation2] sm:$0xff] %vm28_vm0, %v220_v0  ;;  %30 = vst.msk [vmem:[#allocation2 + $0x8] sm:$0xff] %vm28_vm0, %v220_v0  ;;  %v214_v2 = vld [vmem:[%s293_s1 + $0x8] sm:$0xff]  }
   0x2   :  { %204 = vmatpush3.bf16.msra.mxu0 %v213_v1  ;;  %v215_v3 = vld [vmem:[%s294_s0] sm:$0xff]  }
   0x3   :  { %205 = vmatprep.subr.bf16.mxu0 %v220_v0  ;;  %v197_v12 = vld [vmem:[%s295_s3] sm:$0xff]  }
   0x4   :  { %v189_v13 = vld [vmem:[%s296_s2] ss:$0 sm:$0xff]  ;;  %v198_v14 = vunpack.c.l.bf16 %v197_v12  ;;  %v199_v17 = vunpack.c.h.bf16 %v197_v12 }
   0x5   :  { %v190_v41 = vld [vmem:[%s297_s4] ss:$0 sm:$0xff] }
   0x6   :  { %206 = vmatpush3.bf16.msra.mxu0 %v214_v2  ;;  %v191_v43 = vld [vmem:[%s298_s5] ss:$0 sm:$0xff] }
   0x8   :  { %v31_v4 = vld [vmem:[#allocation2] sm:$0xff]  ;;  %v32_v6 = vld [vmem:[#allocation2 + $0x8] sm:$0xff] }
   0x9   :  { %208 = vmatmul.mubr.msk.bf16.vlgmr.msra.gmra.mrb[0].mxu0 %vm28_vm0, %v215_v3 }
  0xdc   :  { %v94_v5 = vpop.f32.mrb[0].mxu0 }
  0xdd   :  { %v101_v7 = vadd.f32 %v94_v5, %v31_v4  ;;  %v209_v8 = vpop.f32.mrb[1].mxu0 }
  0xde   :  { %v97_v9 = vpop.f32.mrb[2].mxu0 }
  0xdf   :  { %103 = vst.msk [vmem:[#allocation2] sm:$0xff] %vm28_vm0, %v101_v7  ;;  %v102_v10 = vadd.f32 %v97_v9, %v32_v6  ;;  %v210_v11 = vpop.f32.mrb[3].mxu0 }
  0xe1   :  { %104 = vst.msk [vmem:[#allocation2 + $0x8] sm:$0xff] %vm28_vm0, %v102_v10 }
  0xe6   :  { %v108_v15 = vld [vmem:[#allocation2] sm:$0xff] }
  0xe7   :  { %v117_v16 = vadd.f32 %v189_v13, %v108_v15 }
  0xe8   :  { %v109_v18 = vld [vmem:[#allocation2 + $0x8] sm:$0xff] }
  0xe9   :  { %v123_v19 = vadd.f32 %v198_v14, %v117_v16  ;;  %v118_v20 = vadd.f32 %v189_v13, %v109_v18 }
  0xeb   :  { %v125_v21 = vsel %vm28_vm0, %v123_v19, 0.0  ;;  %v124_v22 = vadd.f32 %v199_v17, %v118_v20 }
  0xec   :  { %126 = vadd.xlane.f32.xlu0 %v125_v21 }
  0xed   :  { %v128_v23 = vsel %vm28_vm0, %v124_v22, 0.0 }
  0xf0   :  { %129 = vadd.xlane.f32.xlu0 %v128_v23 }
 0x179   :  { %v127_v24 = vpop.xlane.xlu0 %126 }
 0x17a   :  { %v132_v25 = vmul.f32 0.03125, %v127_v24 }
 0x17c   :  { %v134_v26 = vsub.f32 %v123_v19, %v132_v25 }
 0x17d   :  { %v130_v27 = vpop.xlane.xlu0 %129 }
 0x17e   :  { %v133_v28 = vmul.f32 0.03125, %v130_v27  ;;  %v136_v29 = vmul.f32 %v134_v26, %v134_v26 }
 0x180   :  { %v135_v30 = vsub.f32 %v124_v22, %v133_v28  ;;  %v138_v31 = vsel %vm28_vm0, %v136_v29, 0.0 }
 0x181   :  { %139 = vadd.xlane.f32.xlu1 %v138_v31 }
 0x182   :  { %v137_v32 = vmul.f32 %v135_v30, %v135_v30 }
 0x184   :  { %v141_v33 = vsel %vm28_vm0, %v137_v32, 0.0 }
 0x185   :  { %142 = vadd.xlane.f32.xlu1 %v141_v33 }
 0x20e   :  { %v140_v34 = vpop.xlane.xlu1 %139 }
 0x20f   :  { %v144_v35 = vmul.f32 0.03125, %v140_v34 }
 0x211   :  { %v146_v36 = vadd.f32 1e-05, %v144_v35 }
 0x212   :  { %v143_v37 = vpop.xlane.xlu1 %142 }
 0x213   :  { %216 = vrsqrt.f32 %v146_v36  ;;  %v145_v38 = vmul.f32 0.03125, %v143_v37 }
 0x215   :  { %v147_v39 = vadd.f32 1e-05, %v145_v38 }
 0x217   :  { %218 = vrsqrt.f32 %v147_v39 }
 0x21d   :  { %v217_v40 = vpop.eup %216 }
 0x21e   :  { %v150_v42 = vmul.f32 %v217_v40, %v134_v26 }
 0x220   :  { %v159_v44 = vmul.f32 %v190_v41, %v150_v42 }
 0x221   :  { %v219_v45 = vpop.eup %218 }
 0x222   :  { %v168_v46 = vadd.f32 %v191_v43, %v159_v44  ;;  %v151_v47 = vmul.f32 %v219_v45, %v135_v30 }
 0x224   :  { %v194_v48 = vpack.c.bf16 %v168_v46, %v168_v46  ;;  %v160_v49 = vmul.f32 %v190_v41, %v151_v47 }
 0x226   :  { %179 = vst.msk [vmem:[%s299_s6] sm:$0xf] %vm178_vm2, %v194_v48  ;;  %v169_v50 = vadd.f32 %v191_v43, %v160_v49 }
 0x228   :  { %v195_v51 = vpack.c.bf16 %v169_v50, %v169_v50 }
 0x22a   :  { %180 = vst.msk [vmem:[%s299_s6 + $0x4] sm:$0xf] %vm178_vm2, %v195_v51 }

// kernel: custom_transformer_encoder_moe.11
= control target key start
LH: loop header
LB: loop body
LE: loop exit
PB: predicated region body
PF: predicated region fallthrough
CT: control target
= control target key end

     0   :  { %vm31_vm0 = vcmask 261120   ;;  %v337_v0 = vmov 0.0   ;;  %vm338_vm1 = vmmov 0   ;;  %vm146_vm2 = vcmask 523264   ;;  %s430_s1 = inlined_call_operand.vmem [shape: bf16[32,64], index: 1, kind: input, shape index: {}]   ;;  %s431_s3 = inlined_call_operand.vmem [shape: bf16[64,32], index: 3, kind: input, shape index: {}]   ;;  %s432_s0 = inlined_call_operand.vmem [shape: bf16[16,32], index: 0, kind: input, shape index: {}]   ;;  %s433_s2 = inlined_call_operand.vmem [shape: f32[1,64], index: 2, kind: input, shape index: {}]   ;;  %s434_s4 = inlined_call_operand.vmem [shape: f32[1,32], index: 4, kind: input, shape index: {}]   ;;  %s435_s5 = inlined_call_operand.vmem [shape: f32[1,32], index: 5, kind: input, shape index: {}]   ;;  %s436_s6 = inlined_call_operand.vmem [shape: f32[1,32], index: 6, kind: input, shape index: {}]   ;;  %s437_s7 = inlined_call_operand.vmem [shape: bf16[16,32], index: 7, kind: output, shape index: {}]  }
   0x1   :  { %304 = vmatprep.subr.bf16.mxu0 %v337_v0  ;;  %v326_v1 = vld [vmem:[%s430_s1] sm:$0xff]   ;;  %308 = vmatprep.mubr.msk.bf16.mxu0 %vm338_vm1, %v337_v0  ;;  %32 = vst.msk [vmem:[#allocation2] sm:$0xff] %vm31_vm0, %v337_v0  ;;  %33 = vst.msk [vmem:[#allocation2 + $0x8] sm:$0xff] %vm31_vm0, %v337_v0  ;;  %v327_v2 = vld [vmem:[%s430_s1 + $0x8] sm:$0xff]   ;;  %vm268_vm3 = vcmask 257024  }
   0x2   :  { %312 = vmatprep.subr.bf16.mxu1 %v337_v0  ;;  %320 = vmatprep.mubr.msk.bf16.mxu1 %vm338_vm1, %v337_v0  ;;  %v329_v3 = vld [vmem:[%s431_s3] sm:$0xff]   ;;  %v330_v5 = vld [vmem:[%s431_s3 + $0x8] sm:$0xff]   ;;  %v331_v6 = vld [vmem:[%s431_s3 + $0x10] sm:$0xff]  }
   0x3   :  { %305 = vmatpush3.bf16.msra.mxu0 %v326_v1  ;;  %v328_v4 = vld [vmem:[%s432_s0] sm:$0xff]   ;;  %313 = vmatpush3.bf16.msra.mxu1 %v329_v3  ;;  %v332_v7 = vld [vmem:[%s431_s3 + $0x18] sm:$0xff]  }
   0x4   :  { %306 = vmatprep.subr.bf16.mxu0 %v337_v0  ;;  %314 = vmatprep.subr.bf16.mxu1 %v337_v0  ;;  %v275_v8 = vld [vmem:[%s433_s2] ss:$0 sm:$0xff] }
   0x5   :  { %v293_v26 = vld [vmem:[%s432_s0] sm:$0xff]  }
   0x6   :  { %v285_v27 = vld [vmem:[%s434_s4] ss:$0 sm:$0xff]  ;;  %v294_v28 = vunpack.c.l.bf16 %v293_v26  ;;  %v295_v31 = vunpack.c.h.bf16 %v293_v26 }
   0x7   :  { %307 = vmatpush3.bf16.msra.mxu0 %v327_v2  ;;  %315 = vmatpush3.bf16.msra.mxu1 %v330_v5  ;;  %v286_v55 = vld [vmem:[%s435_s5] ss:$0 sm:$0xff] }
   0x8   :  { %316 = vmatprep.subr.bf16.mxu1 %v337_v0  ;;  %v111_v18 = vld [vmem:[#allocation2] sm:$0xff]  ;;  %v112_v20 = vld [vmem:[#allocation2 + $0x8] sm:$0xff] }
   0x9   :  { %v287_v57 = vld [vmem:[%s436_s6] ss:$0 sm:$0xff] }
   0xa   :  { %309 = vmatmul.mubr.msk.bf16.vlgmr.msra.gmra.mrb[0].mxu0 %vm31_vm0, %v328_v4 }
   0xb   :  { %317 = vmatpush3.bf16.msra.mxu1 %v331_v6 }
   0xc   :  { %318 = vmatprep.subr.bf16.mxu1 %v337_v0 }
   0xf   :  { %319 = vmatpush3.bf16.msra.mxu1 %v332_v7 }
  0xdd   :  { %v102_v9 = vpop.f32.mrb[0].mxu0 }
  0xde   :  { %v103_v10 = vadd.f32 %v275_v8, %v102_v9  ;;  %v310_v11 = vpop.f32.mrb[1].mxu0 }
  0xdf   :  { %v105_v12 = vpop.f32.mrb[2].mxu0 }
  0xe0   :  { %v106_v13 = vadd.f32 %v275_v8, %v105_v12  ;;  %v311_v14 = vpop.f32.mrb[3].mxu0  ;;  %v109_v15 = vmax.f32 %v103_v10, 0.0 }
  0xe2   :  { %v110_v16 = vmax.f32 %v106_v13, 0.0 }
  0xe4   :  { %v113_v17 = vpack.c.bf16 %v110_v16, %v109_v15 }
  0xe6   :  { %321 = vmatmul.mubr.msk.bf16.vlgmr.msra.gmra.mrb[0].mxu1 %vm146_vm2, %v113_v17 }
 0x1b9   :  { %v184_v19 = vpop.f32.mrb[0].mxu1 }
 0x1ba   :  { %v191_v21 = vadd.f32 %v184_v19, %v111_v18  ;;  %v322_v22 = vpop.f32.mrb[1].mxu1 }
 0x1bb   :  { %v187_v23 = vpop.f32.mrb[2].mxu1 }
 0x1bc   :  { %193 = vst.msk [vmem:[#allocation2] sm:$0xff] %vm31_vm0, %v191_v21  ;;  %v192_v24 = vadd.f32 %v187_v23, %v112_v20  ;;  %v323_v25 = vpop.f32.mrb[3].mxu1 }
 0x1be   :  { %194 = vst.msk [vmem:[#allocation2 + $0x8] sm:$0xff] %vm31_vm0, %v192_v24 }
 0x1c3   :  { %v198_v29 = vld [vmem:[#allocation2] sm:$0xff] }
 0x1c4   :  { %v207_v30 = vadd.f32 %v285_v27, %v198_v29 }
 0x1c5   :  { %v199_v32 = vld [vmem:[#allocation2 + $0x8] sm:$0xff] }
 0x1c6   :  { %v213_v33 = vadd.f32 %v294_v28, %v207_v30  ;;  %v208_v34 = vadd.f32 %v285_v27, %v199_v32 }
 0x1c8   :  { %v215_v35 = vsel %vm31_vm0, %v213_v33, 0.0  ;;  %v214_v36 = vadd.f32 %v295_v31, %v208_v34 }
 0x1c9   :  { %216 = vadd.xlane.f32.xlu0 %v215_v35 }
 0x1ca   :  { %v218_v37 = vsel %vm31_vm0, %v214_v36, 0.0 }
 0x1cd   :  { %219 = vadd.xlane.f32.xlu0 %v218_v37 }
 0x256   :  { %v217_v38 = vpop.xlane.xlu0 %216 }
 0x257   :  { %v222_v39 = vmul.f32 0.03125, %v217_v38 }
 0x259   :  { %v224_v40 = vsub.f32 %v213_v33, %v222_v39 }
 0x25a   :  { %v220_v41 = vpop.xlane.xlu0 %219 }
 0x25b   :  { %v223_v42 = vmul.f32 0.03125, %v220_v41  ;;  %v226_v43 = vmul.f32 %v224_v40, %v224_v40 }
 0x25d   :  { %v225_v44 = vsub.f32 %v214_v36, %v223_v42  ;;  %v228_v45 = vsel %vm31_vm0, %v226_v43, 0.0 }
 0x25e   :  { %229 = vadd.xlane.f32.xlu1 %v228_v45 }
 0x25f   :  { %v227_v46 = vmul.f32 %v225_v44, %v225_v44 }
 0x261   :  { %v231_v47 = vsel %vm31_vm0, %v227_v46, 0.0 }
 0x262   :  { %232 = vadd.xlane.f32.xlu1 %v231_v47 }
 0x2eb   :  { %v230_v48 = vpop.xlane.xlu1 %229 }
 0x2ec   :  { %v234_v49 = vmul.f32 0.03125, %v230_v48 }
 0x2ee   :  { %v236_v50 = vadd.f32 1e-05, %v234_v49 }
 0x2ef   :  { %v233_v51 = vpop.xlane.xlu1 %232 }
 0x2f0   :  { %333 = vrsqrt.f32 %v236_v50  ;;  %v235_v52 = vmul.f32 0.03125, %v233_v51 }
 0x2f2   :  { %v237_v53 = vadd.f32 1e-05, %v235_v52 }
 0x2f4   :  { %335 = vrsqrt.f32 %v237_v53 }
 0x2fa   :  { %v334_v54 = vpop.eup %333 }
 0x2fb   :  { %v240_v56 = vmul.f32 %v334_v54, %v224_v40 }
 0x2fd   :  { %v249_v58 = vmul.f32 %v286_v55, %v240_v56 }
 0x2fe   :  { %v336_v59 = vpop.eup %335 }
 0x2ff   :  { %v258_v60 = vadd.f32 %v287_v57, %v249_v58  ;;  %v241_v61 = vmul.f32 %v336_v59, %v225_v44 }
 0x301   :  { %v290_v62 = vpack.c.bf16 %v258_v60, %v258_v60  ;;  %v250_v63 = vmul.f32 %v286_v55, %v241_v61 }
 0x303   :  { %269 = vst.msk [vmem:[%s437_s7] sm:$0xf] %vm268_vm3, %v290_v62  ;;  %v259_v0 = vadd.f32 %v287_v57, %v250_v63 }
 0x305   :  { %v291_v1 = vpack.c.bf16 %v259_v0, %v259_v0 }
 0x307   :  { %270 = vst.msk [vmem:[%s437_s7 + $0x4] sm:$0xf] %vm268_vm3, %v291_v1 }

// kernel: custom_transformer_encoder_moe.15
= control target key start
LH: loop header
LB: loop body
LE: loop exit
PB: predicated region body
PF: predicated region fallthrough
CT: control target
= control target key end

     0   :  { %v364_v1 = vmov 0.0   ;;  %vm365_vm0 = vmmov 0   ;;  %vm32_vm1 = vcmask 261120   ;;  %s468_s0 = inlined_call_operand.vmem [shape: bf16[16,32], index: 0, kind: input, shape index: {}]   ;;  %s469_s1 = inlined_call_operand.vmem [shape: bf16[32,64], index: 1, kind: input, shape index: {}]   ;;  %s470_s2 = inlined_call_operand.vmem [shape: f32[1,64], index: 2, kind: input, shape index: {}]   ;;  %s471_s3 = inlined_call_operand.vmem [shape: bf16[64,32], index: 3, kind: input, shape index: {}]   ;;  %s472_s4 = inlined_call_operand.vmem [shape: f32[1,32], index: 4, kind: input, shape index: {}]   ;;  %s473_s5 = inlined_call_operand.vmem [shape: f32[1,32], index: 5, kind: input, shape index: {}]   ;;  %s474_s6 = inlined_call_operand.vmem [shape: f32[1,32], index: 6, kind: input, shape index: {}]   ;;  %s475_s7 = inlined_call_operand.hbm [shape: f32[16,32], index: 7, kind: output, shape index: {}]  }
   0x1   :  { %v329_v0 = vld [vmem:[%s469_s1] sm:$0xff]   ;;  %304 = vmatprep.subr.bf16.mxu0 %v364_v1  ;;  %312 = vmatprep.subr.bf16.mxu1 %v364_v1  ;;  %v330_v2 = vld [vmem:[%s469_s1 + $0x8] sm:$0xff]   ;;  %33 = vst.msk [vmem:[#allocation2] sm:$0xff] %vm32_vm1, %v364_v1  ;;  %34 = vst.msk [vmem:[#allocation2 + $0x8] sm:$0xff] %vm32_vm1, %v364_v1 }
   0x2   :  { %305 = vmatpush3.bf16.msra.mxu0 %v329_v0  ;;  %308 = vmatprep.mubr.msk.bf16.mxu0 %vm365_vm0, %v364_v1  ;;  %v332_v3 = vld [vmem:[%s471_s3] sm:$0xff]   ;;  %v333_v5 = vld [vmem:[%s471_s3 + $0x8] sm:$0xff]  }
   0x3   :  { %306 = vmatprep.subr.bf16.mxu0 %v364_v1  ;;  %320 = vmatprep.mubr.msk.bf16.mxu1 %vm365_vm0, %v364_v1  ;;  %v331_v4 = vld [vmem:[%s468_s0] sm:$0xff]  }
   0x4   :  { %313 = vmatpush3.bf16.msra.mxu1 %v332_v3 }
   0x5   :  { %314 = vmatprep.subr.bf16.mxu1 %v364_v1 }
   0x6   :  { %307 = vmatpush3.bf16.msra.mxu0 %v330_v2 }
   0x7   :  { %12 = vsyncpa [#allocation4], 0  ;;  %v334_v6 = vld [vmem:[%s471_s3 + $0x10] sm:$0xff]   ;;  %v335_v7 = vld [vmem:[%s471_s3 + $0x18] sm:$0xff]   ;;  %vm147_vm2 = vcmask 523264   ;;  %s366_s20 = smov [#allocation3]  }
   0x8   :  { %315 = vmatpush3.bf16.msra.mxu1 %v333_v5  ;;  %v279_v8 = vld [vmem:[%s470_s2] ss:$0 sm:$0xff]  ;;  %v113_v20 = vld [vmem:[#allocation2 + $0x8] sm:$0xff]  ;;  %s268_s21 = sshll.u32 %s366_s20, 4  ;;  %s269_s21 = int_to_ptr.vmem [resolvable:$true] %s268_s21 }
   0x9   :  { %309 = vmatmul.mubr.msk.bf16.vlgmr.msra.gmra.mrb[0].mxu0 %vm32_vm1, %v331_v4  ;;  %316 = vmatprep.subr.bf16.mxu1 %v364_v1  ;;  %v112_v18 = vld [vmem:[#allocation2] sm:$0xff]  ;;  %s340_s22 = scalar_lea.vmem %s269_s21, 256  ;;  %p345_p1 = scmp.lt.s32.totalorder %s269_s21, %s269_s21 }
   0xa   :  { %v293_v26 = vld [vmem:[%s468_s0] sm:$0xff]   ;;  %p341_p0 = scmp.ne.s32.totalorder %s269_s21, %s340_s22  ;;  %p346_p2 = scmp.lt.s32.totalorder %s340_s22, %s340_s22 }
   0xb   :  { %v289_v27 = vld [vmem:[%s472_s4] ss:$0 sm:$0xff]  ;;  %v294_v28 = vunpack.c.l.bf16 %v293_v26  ;;  %v295_v31 = vunpack.c.h.bf16 %v293_v26 }
   0xc   :  { %317 = vmatpush3.bf16.msra.mxu1 %v334_v6  ;;  %v290_v55 = vld [vmem:[%s473_s5] ss:$0 sm:$0xff]  ;;  %p347_p3 = por %p346_p2, %p345_p1 }
   0xd   :  { %318 = vmatprep.subr.bf16.mxu1 %v364_v1  ;;  %v291_v57 = vld [vmem:[%s474_s6] ss:$0 sm:$0xff] }
   0xe   :  { %p348_p4 = pnand %p347_p3, %p341_p0 }
  0x10   :  { %319 = vmatpush3.bf16.msra.mxu1 %v335_v7 }
  0xdc   :  { %v103_v9 = vpop.f32.mrb[0].mxu0 }
  0xdd   :  { %v104_v10 = vadd.f32 %v279_v8, %v103_v9  ;;  %v310_v11 = vpop.f32.mrb[1].mxu0 }
  0xde   :  { %v106_v12 = vpop.f32.mrb[2].mxu0 }
  0xdf   :  { %v107_v13 = vadd.f32 %v279_v8, %v106_v12  ;;  %v311_v14 = vpop.f32.mrb[3].mxu0  ;;  %v110_v15 = vmax.f32 %v104_v10, 0.0 }
  0xe1   :  { %v111_v16 = vmax.f32 %v107_v13, 0.0 }
  0xe3   :  { %v114_v17 = vpack.c.bf16 %v111_v16, %v110_v15 }
  0xe5   :  { %321 = vmatmul.mubr.msk.bf16.vlgmr.msra.gmra.mrb[0].mxu1 %vm147_vm2, %v114_v17 }
 0x1b8   :  { %v185_v19 = vpop.f32.mrb[0].mxu1 }
 0x1b9   :  { %v192_v21 = vadd.f32 %v185_v19, %v112_v18  ;;  %v322_v22 = vpop.f32.mrb[1].mxu1 }
 0x1ba   :  { %v188_v23 = vpop.f32.mrb[2].mxu1 }
 0x1bb   :  { %194 = vst.msk [vmem:[#allocation2] sm:$0xff] %vm32_vm1, %v192_v21  ;;  %v193_v24 = vadd.f32 %v188_v23, %v113_v20  ;;  %v323_v25 = vpop.f32.mrb[3].mxu1 }
 0x1bd   :  { %195 = vst.msk [vmem:[#allocation2 + $0x8] sm:$0xff] %vm32_vm1, %v193_v24 }
 0x1c2   :  { %v199_v29 = vld [vmem:[#allocation2] sm:$0xff] }
 0x1c3   :  { %v208_v30 = vadd.f32 %v289_v27, %v199_v29 }
 0x1c4   :  { %v200_v32 = vld [vmem:[#allocation2 + $0x8] sm:$0xff] }
 0x1c5   :  { %v214_v33 = vadd.f32 %v294_v28, %v208_v30  ;;  %v209_v34 = vadd.f32 %v289_v27, %v200_v32 }
 0x1c7   :  { %v216_v35 = vsel %vm32_vm1, %v214_v33, 0.0  ;;  %v215_v36 = vadd.f32 %v295_v31, %v209_v34 }
 0x1c8   :  { %217 = vadd.xlane.f32.xlu0 %v216_v35 }
 0x1c9   :  { %v219_v37 = vsel %vm32_vm1, %v215_v36, 0.0 }
 0x1cc   :  { %220 = vadd.xlane.f32.xlu0 %v219_v37 }
 0x255   :  { %v218_v38 = vpop.xlane.xlu0 %217 }
 0x256   :  { %v223_v39 = vmul.f32 0.03125, %v218_v38 }
 0x258   :  { %v225_v40 = vsub.f32 %v214_v33, %v223_v39 }
 0x259   :  { %v221_v41 = vpop.xlane.xlu0 %220 }
 0x25a   :  { %v224_v42 = vmul.f32 0.03125, %v221_v41  ;;  %v227_v43 = vmul.f32 %v225_v40, %v225_v40 }
 0x25c   :  { %v226_v44 = vsub.f32 %v215_v36, %v224_v42  ;;  %v229_v45 = vsel %vm32_vm1, %v227_v43, 0.0 }
 0x25d   :  { %230 = vadd.xlane.f32.xlu1 %v229_v45 }
 0x25e   :  { %v228_v46 = vmul.f32 %v226_v44, %v226_v44 }
 0x260   :  { %v232_v47 = vsel %vm32_vm1, %v228_v46, 0.0 }
 0x261   :  { %233 = vadd.xlane.f32.xlu1 %v232_v47 }
 0x2ea   :  { %v231_v48 = vpop.xlane.xlu1 %230 }
 0x2eb   :  { %v235_v49 = vmul.f32 0.03125, %v231_v48 }
 0x2ed   :  { %v237_v50 = vadd.f32 1e-05, %v235_v49 }
 0x2ee   :  { %v234_v51 = vpop.xlane.xlu1 %233 }
 0x2ef   :  { %336 = vrsqrt.f32 %v237_v50  ;;  %v236_v52 = vmul.f32 0.03125, %v234_v51 }
 0x2f1   :  { %v238_v53 = vadd.f32 1e-05, %v236_v52 }
 0x2f3   :  { %338 = vrsqrt.f32 %v238_v53 }
 0x2f9   :  { %v337_v54 = vpop.eup %336 }
 0x2fa   :  { %v241_v56 = vmul.f32 %v337_v54, %v225_v40 }
 0x2fc   :  { %v250_v58 = vmul.f32 %v290_v55, %v241_v56 }
 0x2fd   :  { %v339_v59 = vpop.eup %338 }
 0x2fe   :  { %v242_v60 = vmul.f32 %v339_v59, %v226_v44  ;;  %v259_v61 = vadd.f32 %v291_v57, %v250_v58 }
 0x300   :  { %v251_v62 = vmul.f32 %v290_v55, %v242_v60  ;;  %261 = vst.msk [vmem:[#allocation3] sm:$0xff] %vm32_vm1, %v259_v61 }
 0x302   :  { %v260_v63 = vadd.f32 %v291_v57, %v251_v62 }
 0x304   :  { %262 = vst.msk [vmem:[#allocation3 + $0x8] sm:$0xff] %vm32_vm1, %v260_v63 }
 0x305   :  { %351 = shalt.err (!%p348_p4)
}
 0x306   :  { %s352_s23 = scalar_lea.hbm %s475_s7, 256 }
 0x307   :  { %p353_p5 = scmp.ne.s32.totalorder %s475_s7, %s352_s23  ;;  %p356_p6 = scmp.lt.u32.totalorder %s352_s23, %s475_s7 }
 0x309   :  { %p358_p7 = pnand %p356_p6, %p353_p5 }
 0x30b   :  { %361 = shalt.err (!%p358_p7)
}
 0x30c   :  { %s367_s28 = smov 128   ;;  %s368_s29 = smov 8  }
 0x30d   :  { %274 = dma.vmem_to_hbm [thread:$0]  %s269_s21, 256, %s475_s7, [#allocation4], %s367_s28, %s367_s28, %s368_s29  }
 0x30e   :  { %362 = dma.done.wait [#allocation4], 256  }
 0x30f   :  { %363 = vsyncadd [#allocation4], 4294967040 }
 0x310   :  { %278 = vsyncpa [#allocation4], 1 }

</bundles_post_ra>
